<compile_context>
chip_gen: v7x
topology: tpu7x:2x2x1
jax: 0.10.0
libtpu: 0.0.40
codegen_flags: <defaults>
</compile_context>

<pallas_src>
import functools

import jax
import jax.numpy as jnp
from jax.experimental import pallas as pl
from jax.experimental.pallas import tpu as pltpu

_VMEM = pl.BlockSpec(memory_space=pltpu.MemorySpace.VMEM)
_LN_EPS = 1e-5


# --------------------------------------------------------------------------
# Fused encoder kernel
# --------------------------------------------------------------------------
def _encoder_kernel(n_emb, n_bern, *refs):
    out_ref, hid_ref = refs[-2], refs[-1]
    it = iter(refs[:-2])
    src_ref = next(it)                       # (S*B, emb_dim-2)
    init_ref = next(it)                      # (B, 14)
    emb_layers = [(next(it), next(it)) for _ in range(n_emb)]
    emb_gamma, emb_beta = next(it), next(it)
    bern_layers = [(next(it), next(it)) for _ in range(n_bern)]
    bern_gamma, bern_beta = next(it), next(it)
    wih_ref = next(it)                       # (E, 6H)  cols [r_f r_b z_f z_b n_f n_b]
    gib_ref = next(it)                       # (1, 6H)  bih (+ bhh_r, bhh_z folded)
    whh_ref = next(it)                       # (2H, 6H) block-structured recurrent weight
    bhhn_ref = next(it)                      # (1, 2H)  [bhh_n_f | bhh_n_b]
    fcw_ref = next(it)                       # (2H, H)
    fcb_ref = next(it)                       # (1, H)

    S, B, H2 = out_ref.shape
    H = H2 // 2

    def mlp_ln(h, layers, gamma_ref, beta_ref):
        # (Linear -> ReLU)* -> Linear -> LayerNorm  (dropout = identity)
        for i, (w, b) in enumerate(layers):
            h = jnp.dot(h, w[...], preferred_element_type=jnp.float32) + b[...]
            if i < len(layers) - 1:
                h = jnp.maximum(h, 0.0)
        mean = jnp.mean(h, axis=-1, keepdims=True)
        var = jnp.mean(jnp.square(h - mean), axis=-1, keepdims=True)
        h = (h - mean) * jax.lax.rsqrt(var + _LN_EPS)
        return h * gamma_ref[...] + beta_ref[...]

    # ---- fc_emb over all (S*B) rows at once -------------------------------
    emb = mlp_ln(src_ref[...], emb_layers, emb_gamma, emb_beta)        # (S*B, E)

    # ---- bernstein2hidden: Sigmoid -> MLP -> LayerNorm ---------------------
    # reshape(-1,2,H).permute(1,0,2) means h0_fwd = out[:, :H], h0_bwd = out[:, H:],
    # which is exactly the packed carry h_cat = [h_f | h_b] used below.
    h_cat = mlp_ln(jax.nn.sigmoid(init_ref[...]), bern_layers,
                   bern_gamma, bern_beta)                              # (B, 2H)

    # ---- hoisted GRU input projection (both directions, biases folded) ----
    # Row block t holds BOTH directions' gates for input timestep t, in the
    # gate-major interleaved column layout [r_f r_b z_f z_b n_f n_b].
    gi_all = jnp.dot(emb, wih_ref[...],
                     preferred_element_type=jnp.float32) + gib_ref[...]  # (S*B, 6H)

    whh = whh_ref[...]
    bhh_n = bhhn_ref[...]                                               # (1, 2H)

    # Hoisted lane mask: True on forward-direction columns of the 6H layout.
    lane = jax.lax.broadcasted_iota(jnp.int32, (B, 6 * H), 1)
    fwd_lane = (lane % (2 * H)) < H

    # Statically unrolled time loop (S is small).  Both directions advance
    # together, sharing ONE block-structured recurrent matmul per step.
    for s in range(S):
        t_b = S - 1 - s                      # timestep the backward direction is at
        gh = jnp.dot(h_cat, whh, preferred_element_type=jnp.float32)    # (B, 6H)
        # Merge fwd gates (time s) and bwd gates (time t_b) with one VPU select.
        gi = jnp.where(fwd_lane,
                       gi_all[s * B:(s + 1) * B, :],
                       gi_all[t_b * B:(t_b + 1) * B, :])                # (B, 6H)
        rz = jax.nn.sigmoid(gi[:, 0:4 * H] + gh[:, 0:4 * H])            # one 128-lane call
        r = rz[:, 0:2 * H]                                              # [r_f | r_b]
        z = rz[:, 2 * H:4 * H]                                          # [z_f | z_b]
        n = jnp.tanh(gi[:, 4 * H:6 * H] + r * (gh[:, 4 * H:6 * H] + bhh_n))
        h_cat = (1.0 - z) * n + z * h_cat                               # packed [h_f | h_b]
        # Direct per-step writes into the output (no list carry / stack / concat).
        out_ref[s, :, 0:H] = h_cat[:, 0:H]
        out_ref[t_b, :, H:2 * H] = h_cat[:, H:2 * H]

    # hidden = relu(fc(cat(hidden[-2], hidden[-1]))); h_cat is exactly that concat.
    hid_ref[...] = jnp.maximum(
        jnp.dot(h_cat, fcw_ref[...], preferred_element_type=jnp.float32)
        + fcb_ref[...], 0.0)


# --------------------------------------------------------------------------
# Wrapper: trace-time packing of GRU weights + single pallas_call.
# --------------------------------------------------------------------------
def _pack_gru_params(g, H):
    """Pack per-direction GRU weights into the gate-major interleaved layout."""

    def interleave_cols(a_f, a_b):
        # (rows, 3H) per direction, gate order (r,z,n) -> (rows, 6H)
        # columns [r_f | r_b | z_f | z_b | n_f | n_b]
        pieces = []
        for gidx in range(3):
            pieces.append(a_f[:, gidx * H:(gidx + 1) * H])
            pieces.append(a_b[:, gidx * H:(gidx + 1) * H])
        return jnp.concatenate(pieces, axis=1)

    wih_cat = interleave_cols(g["wih_f"], g["wih_b"])                     # (E, 6H)

    # recurrent weight: rows 0:H (h_f) feed only *_f columns, rows H:2H only *_b.
    top = interleave_cols(g["whh_f"], jnp.zeros_like(g["whh_b"]))
    bot = interleave_cols(jnp.zeros_like(g["whh_f"]), g["whh_b"])
    whh_cat = jnp.concatenate([top, bot], axis=0)                         # (2H, 6H)

    def fold(bih, bhh):  # fold bhh_r, bhh_z into the input bias; bhh_n stays separate
        return jnp.concatenate([bih[:, :2 * H] + bhh[:, :2 * H], bih[:, 2 * H:]], axis=1)

    gi_bias = interleave_cols(fold(g["bih_f"], g["bhh_f"]),
                              fold(g["bih_b"], g["bhh_b"]))               # (1, 6H)
    bhh_n_cat = jnp.concatenate([g["bhh_f"][:, 2 * H:],
                                 g["bhh_b"][:, 2 * H:]], axis=1)          # (1, 2H)
    return wih_cat, gi_bias, whh_cat, bhh_n_cat


@functools.partial(jax.jit, static_argnames=("hid_dim",))
def encoder_forward(params, src, initial, *, hid_dim):
    S, B, F = src.shape
    H = hid_dim
    wih_cat, gi_bias, whh_cat, bhh_n_cat = _pack_gru_params(params["gru"], H)

    args = [src.reshape(S * B, F), initial]
    for w, b in zip(params["emb_ws"], params["emb_bs"]):
        args += [w, b]
    args += [params["emb_gamma"], params["emb_beta"]]
    for w, b in zip(params["bern_ws"], params["bern_bs"]):
        args += [w, b]
    args += [params["bern_gamma"], params["bern_beta"]]
    args += [wih_cat, gi_bias, whh_cat, bhh_n_cat,
             params["gru"]["fc_w"], params["gru"]["fc_b"]]

    kernel = functools.partial(_encoder_kernel,
                               len(params["emb_ws"]), len(params["bern_ws"]))
    outputs, hidden = pl.pallas_call(
        kernel,
        out_shape=(jax.ShapeDtypeStruct((S, B, 2 * H), jnp.float32),
                   jax.ShapeDtypeStruct((B, H), jnp.float32)),
        in_specs=[_VMEM] * len(args),
        out_specs=(_VMEM, _VMEM),
    )(*args)
    return outputs, hidden


# --------------------------------------------------------------------------
# Parameter construction (deterministic, PyTorch-shaped).
# --------------------------------------------------------------------------
def _dense(key, fan_in, fan_out):
    # NOTE: uses 1/sqrt(fan_in) bound (not PyTorch's GRU 1/sqrt(hidden)); forward
    # parity vs. the JAX reference below is unaffected.
    kw, kb = jax.random.split(key)
    bound = 1.0 / jnp.sqrt(jnp.float32(fan_in))
    w = jax.random.uniform(kw, (fan_in, fan_out), jnp.float32, -bound, bound)
    b = jax.random.uniform(kb, (1, fan_out), jnp.float32, -bound, bound)
    return w, b


def make_params(key, *, emb_dim, hid_dim, emb_hid_dim, emb_n_layers, enc_bern_n_layers):
    keys = iter(jax.random.split(key, 64))
    p = {}

    # fc_emb: Linear(emb_dim-2, hid) -> [Linear(hid,hid)]*emb_n_layers -> Linear(hid, emb_hid) -> LN
    ws, bs = [], []
    w, b = _dense(next(keys), emb_dim - 2, hid_dim); ws.append(w); bs.append(b)
    for _ in range(emb_n_layers):
        w, b = _dense(next(keys), hid_dim, hid_dim); ws.append(w); bs.append(b)
    w, b = _dense(next(keys), hid_dim, emb_hid_dim); ws.append(w); bs.append(b)
    p["emb_ws"], p["emb_bs"] = ws, bs
    p["emb_gamma"] = jnp.ones((1, emb_hid_dim), jnp.float32)
    p["emb_beta"] = jnp.zeros((1, emb_hid_dim), jnp.float32)

    # bernstein2hidden: Sigmoid -> Linear(14, hid) -> [Linear(hid,hid)]* -> Linear(hid, 2*hid) -> LN
    ws, bs = [], []
    w, b = _dense(next(keys), 14, hid_dim); ws.append(w); bs.append(b)
    for _ in range(enc_bern_n_layers):
        w, b = _dense(next(keys), hid_dim, hid_dim); ws.append(w); bs.append(b)
    w, b = _dense(next(keys), hid_dim, 2 * hid_dim); ws.append(w); bs.append(b)
    p["bern_ws"], p["bern_bs"] = ws, bs
    p["bern_gamma"] = jnp.ones((1, 2 * hid_dim), jnp.float32)
    p["bern_beta"] = jnp.zeros((1, 2 * hid_dim), jnp.float32)

    # bidirectional GRU (weights stored pre-transposed: (in, 3H) / (H, 3H), gate order r,z,n)
    gru = {}
    for d in ("f", "b"):
        gru[f"wih_{d}"], gru[f"bih_{d}"] = _dense(next(keys), emb_hid_dim, 3 * hid_dim)
        gru[f"whh_{d}"], gru[f"bhh_{d}"] = _dense(next(keys), hid_dim, 3 * hid_dim)
    gru["fc_w"], gru["fc_b"] = _dense(next(keys), 2 * hid_dim, hid_dim)
    p["gru"] = gru
    return p


# --------------------------------------------------------------------------
# Pure-JAX reference (unfused, per-direction, PyTorch op order) for validation.
# --------------------------------------------------------------------------
def _ref_mlp(x, ws, bs, g, beta, pre_sigmoid):
    h = jax.nn.sigmoid(x) if pre_sigmoid else x
    for i, (w, b) in enumerate(zip(ws, bs)):
        h = h @ w + b
        if i < len(ws) - 1:
            h = jnp.maximum(h, 0.0)
    m = jnp.mean(h, -1, keepdims=True)
    v = jnp.mean(jnp.square(h - m), -1, keepdims=True)
    return (h - m) * jax.lax.rsqrt(v + _LN_EPS) * g + beta


def _ref_encoder(params, src, initial, hid_dim):
    S, B, F = src.shape
    emb = _ref_mlp(src.reshape(S * B, F), params["emb_ws"], params["emb_bs"],
                   params["emb_gamma"], params["emb_beta"], False).reshape(S, B, -1)
    init_h = _ref_mlp(initial, params["bern_ws"], params["bern_bs"],
                      params["bern_gamma"], params["bern_beta"], True)
    h0 = jnp.transpose(init_h.reshape(-1, 2, hid_dim), (1, 0, 2))
    g = params["gru"]
    H = hid_dim

    def cell(x_t, h, wih, whh, bih, bhh):
        gi = x_t @ wih + bih
        gh = h @ whh + bhh
        r = jax.nn.sigmoid(gi[:, :H] + gh[:, :H])
        z = jax.nn.sigmoid(gi[:, H:2 * H] + gh[:, H:2 * H])
        n = jnp.tanh(gi[:, 2 * H:] + r * gh[:, 2 * H:])
        return (1.0 - z) * n + z * h

    h_f, h_b = h0[0], h0[1]
    fwd, bwd = [], [None] * S
    for t in range(S):
        h_f = cell(emb[t], h_f, g["wih_f"], g["whh_f"], g["bih_f"], g["bhh_f"])
        fwd.append(h_f)
    for t in range(S - 1, -1, -1):
        h_b = cell(emb[t], h_b, g["wih_b"], g["whh_b"], g["bih_b"], g["bhh_b"])
        bwd[t] = h_b
    outputs = jnp.concatenate([jnp.stack(fwd), jnp.stack(bwd)], axis=-1)
    hidden = jnp.maximum(jnp.concatenate([h_f, h_b], -1) @ g["fc_w"] + g["fc_b"], 0.0)
    return outputs, hidden


if __name__ == "__main__":
    # small config consistent with the module's __init__
    cfg = dict(emb_dim=10, hid_dim=32, emb_hid_dim=16,
               emb_n_layers=2, enc_bern_n_layers=2)
    SEQ, BATCH = 8, 2

    key = jax.random.PRNGKey(0)
    k_par, k_src, k_init = jax.random.split(key, 3)
    params = make_params(k_par, **cfg)
    src = jax.random.normal(k_src, (SEQ, BATCH, cfg["emb_dim"] - 2), jnp.float32)
    initial = jax.random.normal(k_init, (BATCH, 14), jnp.float32)

    outputs, hidden = jax.block_until_ready(
        encoder_forward(params, src, initial, hid_dim=cfg["hid_dim"]))

    ref_out, ref_hid = _ref_encoder(params, src, initial, cfg["hid_dim"])
    assert outputs.shape == (SEQ, BATCH, 2 * cfg["hid_dim"])
    assert hidden.shape == (BATCH, cfg["hid_dim"])
    # Kernel uses folded biases and a repacked recurrent matmul, so exact bitwise
    # parity is not expected; 1e-4 was comfortably met by the previous run.
    assert jnp.allclose(outputs, ref_out, atol=1e-4, rtol=1e-4), \
        float(jnp.max(jnp.abs(outputs - ref_out)))
    assert jnp.allclose(hidden, ref_hid, atol=1e-4, rtol=1e-4), \
        float(jnp.max(jnp.abs(hidden - ref_hid)))

    print("KERNEL_OK")
</pallas_src>

<mosaic_0001>
module attributes {stable_mosaic.version = 11 : i64} {
  func.func @_encoder_kernel(%arg0: memref<16x8xf32, #tpu.memory_space<vmem>>, %arg1: memref<2x14xf32, #tpu.memory_space<vmem>>, %arg2: memref<8x32xf32, #tpu.memory_space<vmem>>, %arg3: memref<1x32xf32, #tpu.memory_space<vmem>>, %arg4: memref<32x32xf32, #tpu.memory_space<vmem>>, %arg5: memref<1x32xf32, #tpu.memory_space<vmem>>, %arg6: memref<32x32xf32, #tpu.memory_space<vmem>>, %arg7: memref<1x32xf32, #tpu.memory_space<vmem>>, %arg8: memref<32x16xf32, #tpu.memory_space<vmem>>, %arg9: memref<1x16xf32, #tpu.memory_space<vmem>>, %arg10: memref<1x16xf32, #tpu.memory_space<vmem>>, %arg11: memref<1x16xf32, #tpu.memory_space<vmem>>, %arg12: memref<14x32xf32, #tpu.memory_space<vmem>>, %arg13: memref<1x32xf32, #tpu.memory_space<vmem>>, %arg14: memref<32x32xf32, #tpu.memory_space<vmem>>, %arg15: memref<1x32xf32, #tpu.memory_space<vmem>>, %arg16: memref<32x32xf32, #tpu.memory_space<vmem>>, %arg17: memref<1x32xf32, #tpu.memory_space<vmem>>, %arg18: memref<32x64xf32, #tpu.memory_space<vmem>>, %arg19: memref<1x64xf32, #tpu.memory_space<vmem>>, %arg20: memref<1x64xf32, #tpu.memory_space<vmem>>, %arg21: memref<1x64xf32, #tpu.memory_space<vmem>>, %arg22: memref<16x192xf32, #tpu.memory_space<vmem>>, %arg23: memref<1x192xf32, #tpu.memory_space<vmem>>, %arg24: memref<64x192xf32, #tpu.memory_space<vmem>>, %arg25: memref<1x64xf32, #tpu.memory_space<vmem>>, %arg26: memref<64x32xf32, #tpu.memory_space<vmem>>, %arg27: memref<1x32xf32, #tpu.memory_space<vmem>>, %arg28: memref<8x2x64xf32, #tpu.memory_space<vmem>>, %arg29: memref<2x32xf32, #tpu.memory_space<vmem>>) attributes {dimension_semantics = [], scalar_prefetch = 0 : i64, scratch_operands = 0 : i64, tpu.core_type = #tpu.core_type<tc>} {
    %c0 = arith.constant 0 : index
    %c0_0 = arith.constant 0 : index
    %0 = vector.load %arg0[%c0, %c0_0] : memref<16x8xf32, #tpu.memory_space<vmem>>, vector<16x8xf32>
    %c0_1 = arith.constant 0 : index
    %c0_2 = arith.constant 0 : index
    %1 = vector.load %arg2[%c0_1, %c0_2] : memref<8x32xf32, #tpu.memory_space<vmem>>, vector<8x32xf32>
    %cst = arith.constant dense<0.000000e+00> : vector<16x32xf32>
    %2 = tpu.matmul %0, %1, %cst {dimension_numbers = #tpu.dot_dimension_numbers<[1], [0], [0], [1], [0, 0, 1, 1], [], []>} : vector<16x8xf32>, vector<8x32xf32>, vector<16x32xf32> -> vector<16x32xf32>
    %c0_3 = arith.constant 0 : index
    %c0_4 = arith.constant 0 : index
    %3 = vector.load %arg3[%c0_3, %c0_4] : memref<1x32xf32, #tpu.memory_space<vmem>>, vector<1x32xf32>
    %4 = vector.broadcast %3 : vector<1x32xf32> to vector<16x32xf32>
    %5 = arith.addf %2, %4 : vector<16x32xf32>
    %cst_5 = arith.constant 0.000000e+00 : f32
    %6 = vector.broadcast %cst_5 : f32 to vector<16x32xf32>
    %7 = arith.maximumf %5, %6 : vector<16x32xf32>
    %c0_6 = arith.constant 0 : index
    %c0_7 = arith.constant 0 : index
    %8 = vector.load %arg4[%c0_6, %c0_7] : memref<32x32xf32, #tpu.memory_space<vmem>>, vector<32x32xf32>
    %cst_8 = arith.constant dense<0.000000e+00> : vector<16x32xf32>
    %9 = tpu.matmul %7, %8, %cst_8 {dimension_numbers = #tpu.dot_dimension_numbers<[1], [0], [0], [1], [0, 0, 1, 1], [], []>} : vector<16x32xf32>, vector<32x32xf32>, vector<16x32xf32> -> vector<16x32xf32>
    %c0_9 = arith.constant 0 : index
    %c0_10 = arith.constant 0 : index
    %10 = vector.load %arg5[%c0_9, %c0_10] : memref<1x32xf32, #tpu.memory_space<vmem>>, vector<1x32xf32>
    %11 = vector.broadcast %10 : vector<1x32xf32> to vector<16x32xf32>
    %12 = arith.addf %9, %11 : vector<16x32xf32>
    %cst_11 = arith.constant 0.000000e+00 : f32
    %13 = vector.broadcast %cst_11 : f32 to vector<16x32xf32>
    %14 = arith.maximumf %12, %13 : vector<16x32xf32>
    %c0_12 = arith.constant 0 : index
    %c0_13 = arith.constant 0 : index
    %15 = vector.load %arg6[%c0_12, %c0_13] : memref<32x32xf32, #tpu.memory_space<vmem>>, vector<32x32xf32>
    %cst_14 = arith.constant dense<0.000000e+00> : vector<16x32xf32>
    %16 = tpu.matmul %14, %15, %cst_14 {dimension_numbers = #tpu.dot_dimension_numbers<[1], [0], [0], [1], [0, 0, 1, 1], [], []>} : vector<16x32xf32>, vector<32x32xf32>, vector<16x32xf32> -> vector<16x32xf32>
    %c0_15 = arith.constant 0 : index
    %c0_16 = arith.constant 0 : index
    %17 = vector.load %arg7[%c0_15, %c0_16] : memref<1x32xf32, #tpu.memory_space<vmem>>, vector<1x32xf32>
    %18 = vector.broadcast %17 : vector<1x32xf32> to vector<16x32xf32>
    %19 = arith.addf %16, %18 : vector<16x32xf32>
    %cst_17 = arith.constant 0.000000e+00 : f32
    %20 = vector.broadcast %cst_17 : f32 to vector<16x32xf32>
    %21 = arith.maximumf %19, %20 : vector<16x32xf32>
    %c0_18 = arith.constant 0 : index
    %c0_19 = arith.constant 0 : index
    %22 = vector.load %arg8[%c0_18, %c0_19] : memref<32x16xf32, #tpu.memory_space<vmem>>, vector<32x16xf32>
    %cst_20 = arith.constant dense<0.000000e+00> : vector<16x16xf32>
    %23 = tpu.matmul %21, %22, %cst_20 {dimension_numbers = #tpu.dot_dimension_numbers<[1], [0], [0], [1], [0, 0, 1, 1], [], []>} : vector<16x32xf32>, vector<32x16xf32>, vector<16x16xf32> -> vector<16x16xf32>
    %c0_21 = arith.constant 0 : index
    %c0_22 = arith.constant 0 : index
    %24 = vector.load %arg9[%c0_21, %c0_22] : memref<1x16xf32, #tpu.memory_space<vmem>>, vector<1x16xf32>
    %25 = vector.broadcast %24 : vector<1x16xf32> to vector<16x16xf32>
    %26 = arith.addf %23, %25 : vector<16x16xf32>
    %cst_23 = arith.constant dense<0.000000e+00> : vector<16xf32>
    %27 = vector.multi_reduction <add>, %26, %cst_23 [1] : vector<16x16xf32> to vector<16xf32>
    %28 = vector.shape_cast %27 : vector<16xf32> to vector<16x1xf32>
    %cst_24 = arith.constant 1.600000e+01 : f32
    %29 = vector.broadcast %cst_24 : f32 to vector<16x1xf32>
    %30 = arith.divf %28, %29 : vector<16x1xf32>
    %31 = vector.broadcast %30 : vector<16x1xf32> to vector<16x16xf32>
    %32 = arith.subf %26, %31 : vector<16x16xf32>
    %33 = arith.mulf %32, %32 : vector<16x16xf32>
    %cst_25 = arith.constant dense<0.000000e+00> : vector<16xf32>
    %34 = vector.multi_reduction <add>, %33, %cst_25 [1] : vector<16x16xf32> to vector<16xf32>
    %35 = vector.shape_cast %34 : vector<16xf32> to vector<16x1xf32>
    %cst_26 = arith.constant 1.600000e+01 : f32
    %36 = vector.broadcast %cst_26 : f32 to vector<16x1xf32>
    %37 = arith.divf %35, %36 : vector<16x1xf32>
    %38 = vector.broadcast %30 : vector<16x1xf32> to vector<16x16xf32>
    %39 = arith.subf %26, %38 : vector<16x16xf32>
    %cst_27 = arith.constant 9.99999974E-6 : f32
    %40 = vector.broadcast %cst_27 : f32 to vector<16x1xf32>
    %41 = arith.addf %37, %40 : vector<16x1xf32>
    %42 = math.rsqrt %41 : vector<16x1xf32>
    %43 = vector.broadcast %42 : vector<16x1xf32> to vector<16x16xf32>
    %44 = arith.mulf %39, %43 : vector<16x16xf32>
    %c0_28 = arith.constant 0 : index
    %c0_29 = arith.constant 0 : index
    %45 = vector.load %arg10[%c0_28, %c0_29] : memref<1x16xf32, #tpu.memory_space<vmem>>, vector<1x16xf32>
    %46 = vector.broadcast %45 : vector<1x16xf32> to vector<16x16xf32>
    %47 = arith.mulf %44, %46 : vector<16x16xf32>
    %c0_30 = arith.constant 0 : index
    %c0_31 = arith.constant 0 : index
    %48 = vector.load %arg11[%c0_30, %c0_31] : memref<1x16xf32, #tpu.memory_space<vmem>>, vector<1x16xf32>
    %49 = vector.broadcast %48 : vector<1x16xf32> to vector<16x16xf32>
    %50 = arith.addf %47, %49 : vector<16x16xf32>
    %c0_32 = arith.constant 0 : index
    %c0_33 = arith.constant 0 : index
    %51 = vector.load %arg1[%c0_32, %c0_33] : memref<2x14xf32, #tpu.memory_space<vmem>>, vector<2x14xf32>
    %52 = arith.negf %51 : vector<2x14xf32>
    %53 = math.exp %52 : vector<2x14xf32>
    %cst_34 = arith.constant 1.000000e+00 : f32
    %54 = vector.broadcast %cst_34 : f32 to vector<2x14xf32>
    %55 = arith.addf %54, %53 : vector<2x14xf32>
    %56 = arith.divf %54, %55 : vector<2x14xf32>
    %c0_35 = arith.constant 0 : index
    %c0_36 = arith.constant 0 : index
    %57 = vector.load %arg12[%c0_35, %c0_36] : memref<14x32xf32, #tpu.memory_space<vmem>>, vector<14x32xf32>
    %cst_37 = arith.constant dense<0.000000e+00> : vector<2x32xf32>
    %58 = tpu.matmul %56, %57, %cst_37 {dimension_numbers = #tpu.dot_dimension_numbers<[1], [0], [0], [1], [0, 0, 1, 1], [], []>} : vector<2x14xf32>, vector<14x32xf32>, vector<2x32xf32> -> vector<2x32xf32>
    %c0_38 = arith.constant 0 : index
    %c0_39 = arith.constant 0 : index
    %59 = vector.load %arg13[%c0_38, %c0_39] : memref<1x32xf32, #tpu.memory_space<vmem>>, vector<1x32xf32>
    %60 = vector.broadcast %59 : vector<1x32xf32> to vector<2x32xf32>
    %61 = arith.addf %58, %60 : vector<2x32xf32>
    %cst_40 = arith.constant 0.000000e+00 : f32
    %62 = vector.broadcast %cst_40 : f32 to vector<2x32xf32>
    %63 = arith.maximumf %61, %62 : vector<2x32xf32>
    %c0_41 = arith.constant 0 : index
    %c0_42 = arith.constant 0 : index
    %64 = vector.load %arg14[%c0_41, %c0_42] : memref<32x32xf32, #tpu.memory_space<vmem>>, vector<32x32xf32>
    %cst_43 = arith.constant dense<0.000000e+00> : vector<2x32xf32>
    %65 = tpu.matmul %63, %64, %cst_43 {dimension_numbers = #tpu.dot_dimension_numbers<[1], [0], [0], [1], [0, 0, 1, 1], [], []>} : vector<2x32xf32>, vector<32x32xf32>, vector<2x32xf32> -> vector<2x32xf32>
    %c0_44 = arith.constant 0 : index
    %c0_45 = arith.constant 0 : index
    %66 = vector.load %arg15[%c0_44, %c0_45] : memref<1x32xf32, #tpu.memory_space<vmem>>, vector<1x32xf32>
    %67 = vector.broadcast %66 : vector<1x32xf32> to vector<2x32xf32>
    %68 = arith.addf %65, %67 : vector<2x32xf32>
    %cst_46 = arith.constant 0.000000e+00 : f32
    %69 = vector.broadcast %cst_46 : f32 to vector<2x32xf32>
    %70 = arith.maximumf %68, %69 : vector<2x32xf32>
    %c0_47 = arith.constant 0 : index
    %c0_48 = arith.constant 0 : index
    %71 = vector.load %arg16[%c0_47, %c0_48] : memref<32x32xf32, #tpu.memory_space<vmem>>, vector<32x32xf32>
    %cst_49 = arith.constant dense<0.000000e+00> : vector<2x32xf32>
    %72 = tpu.matmul %70, %71, %cst_49 {dimension_numbers = #tpu.dot_dimension_numbers<[1], [0], [0], [1], [0, 0, 1, 1], [], []>} : vector<2x32xf32>, vector<32x32xf32>, vector<2x32xf32> -> vector<2x32xf32>
    %c0_50 = arith.constant 0 : index
    %c0_51 = arith.constant 0 : index
    %73 = vector.load %arg17[%c0_50, %c0_51] : memref<1x32xf32, #tpu.memory_space<vmem>>, vector<1x32xf32>
    %74 = vector.broadcast %73 : vector<1x32xf32> to vector<2x32xf32>
    %75 = arith.addf %72, %74 : vector<2x32xf32>
    %cst_52 = arith.constant 0.000000e+00 : f32
    %76 = vector.broadcast %cst_52 : f32 to vector<2x32xf32>
    %77 = arith.maximumf %75, %76 : vector<2x32xf32>
    %c0_53 = arith.constant 0 : index
    %c0_54 = arith.constant 0 : index
    %78 = vector.load %arg18[%c0_53, %c0_54] : memref<32x64xf32, #tpu.memory_space<vmem>>, vector<32x64xf32>
    %cst_55 = arith.constant dense<0.000000e+00> : vector<2x64xf32>
    %79 = tpu.matmul %77, %78, %cst_55 {dimension_numbers = #tpu.dot_dimension_numbers<[1], [0], [0], [1], [0, 0, 1, 1], [], []>} : vector<2x32xf32>, vector<32x64xf32>, vector<2x64xf32> -> vector<2x64xf32>
    %c0_56 = arith.constant 0 : index
    %c0_57 = arith.constant 0 : index
    %80 = vector.load %arg19[%c0_56, %c0_57] : memref<1x64xf32, #tpu.memory_space<vmem>>, vector<1x64xf32>
    %81 = vector.broadcast %80 : vector<1x64xf32> to vector<2x64xf32>
    %82 = arith.addf %79, %81 : vector<2x64xf32>
    %cst_58 = arith.constant dense<0.000000e+00> : vector<2xf32>
    %83 = vector.multi_reduction <add>, %82, %cst_58 [1] : vector<2x64xf32> to vector<2xf32>
    %84 = vector.shape_cast %83 : vector<2xf32> to vector<2x1xf32>
    %cst_59 = arith.constant 6.400000e+01 : f32
    %85 = vector.broadcast %cst_59 : f32 to vector<2x1xf32>
    %86 = arith.divf %84, %85 : vector<2x1xf32>
    %87 = vector.broadcast %86 : vector<2x1xf32> to vector<2x64xf32>
    %88 = arith.subf %82, %87 : vector<2x64xf32>
    %89 = arith.mulf %88, %88 : vector<2x64xf32>
    %cst_60 = arith.constant dense<0.000000e+00> : vector<2xf32>
    %90 = vector.multi_reduction <add>, %89, %cst_60 [1] : vector<2x64xf32> to vector<2xf32>
    %91 = vector.shape_cast %90 : vector<2xf32> to vector<2x1xf32>
    %cst_61 = arith.constant 6.400000e+01 : f32
    %92 = vector.broadcast %cst_61 : f32 to vector<2x1xf32>
    %93 = arith.divf %91, %92 : vector<2x1xf32>
    %94 = vector.broadcast %86 : vector<2x1xf32> to vector<2x64xf32>
    %95 = arith.subf %82, %94 : vector<2x64xf32>
    %cst_62 = arith.constant 9.99999974E-6 : f32
    %96 = vector.broadcast %cst_62 : f32 to vector<2x1xf32>
    %97 = arith.addf %93, %96 : vector<2x1xf32>
    %98 = math.rsqrt %97 : vector<2x1xf32>
    %99 = vector.broadcast %98 : vector<2x1xf32> to vector<2x64xf32>
    %100 = arith.mulf %95, %99 : vector<2x64xf32>
    %c0_63 = arith.constant 0 : index
    %c0_64 = arith.constant 0 : index
    %101 = vector.load %arg20[%c0_63, %c0_64] : memref<1x64xf32, #tpu.memory_space<vmem>>, vector<1x64xf32>
    %102 = vector.broadcast %101 : vector<1x64xf32> to vector<2x64xf32>
    %103 = arith.mulf %100, %102 : vector<2x64xf32>
    %c0_65 = arith.constant 0 : index
    %c0_66 = arith.constant 0 : index
    %104 = vector.load %arg21[%c0_65, %c0_66] : memref<1x64xf32, #tpu.memory_space<vmem>>, vector<1x64xf32>
    %105 = vector.broadcast %104 : vector<1x64xf32> to vector<2x64xf32>
    %106 = arith.addf %103, %105 : vector<2x64xf32>
    %c0_67 = arith.constant 0 : index
    %c0_68 = arith.constant 0 : index
    %107 = vector.load %arg22[%c0_67, %c0_68] : memref<16x192xf32, #tpu.memory_space<vmem>>, vector<16x192xf32>
    %cst_69 = arith.constant dense<0.000000e+00> : vector<16x192xf32>
    %108 = tpu.matmul %50, %107, %cst_69 {dimension_numbers = #tpu.dot_dimension_numbers<[1], [0], [0], [1], [0, 0, 1, 1], [], []>} : vector<16x16xf32>, vector<16x192xf32>, vector<16x192xf32> -> vector<16x192xf32>
    %c0_70 = arith.constant 0 : index
    %c0_71 = arith.constant 0 : index
    %109 = vector.load %arg23[%c0_70, %c0_71] : memref<1x192xf32, #tpu.memory_space<vmem>>, vector<1x192xf32>
    %110 = vector.broadcast %109 : vector<1x192xf32> to vector<16x192xf32>
    %111 = arith.addf %108, %110 : vector<16x192xf32>
    %c0_72 = arith.constant 0 : index
    %c0_73 = arith.constant 0 : index
    %112 = vector.load %arg24[%c0_72, %c0_73] : memref<64x192xf32, #tpu.memory_space<vmem>>, vector<64x192xf32>
    %c0_74 = arith.constant 0 : index
    %c0_75 = arith.constant 0 : index
    %113 = vector.load %arg25[%c0_74, %c0_75] : memref<1x64xf32, #tpu.memory_space<vmem>>, vector<1x64xf32>
    %114 = tpu.iota {dimensions = array<i32: 1>} : vector<2x192xi32>
    %c64_i32 = arith.constant 64 : i32
    %c0_i32 = arith.constant 0 : i32
    %115 = arith.cmpi eq, %c64_i32, %c0_i32 : i32
    %c1_i32 = arith.constant 1 : i32
    %116 = arith.select %115, %c1_i32, %c64_i32 : i32
    %117 = vector.broadcast %116 : i32 to vector<2x192xi32>
    %118 = arith.remsi %114, %117 : vector<2x192xi32>
    %c0_i32_76 = arith.constant 0 : i32
    %119 = vector.broadcast %c0_i32_76 : i32 to vector<2x192xi32>
    %120 = arith.cmpi ne, %118, %119 : vector<2x192xi32>
    %c0_i32_77 = arith.constant 0 : i32
    %121 = vector.broadcast %c0_i32_77 : i32 to vector<2x192xi32>
    %122 = arith.cmpi slt, %118, %121 : vector<2x192xi32>
    %c0_i32_78 = arith.constant 0 : i32
    %123 = arith.cmpi slt, %116, %c0_i32_78 : i32
    %124 = vector.broadcast %123 : i1 to vector<2x192xi1>
    %125 = vector.broadcast %124 : vector<2x192xi1> to vector<2x192xi1>
    %126 = arith.xori %122, %125 : vector<2x192xi1>
    %127 = arith.andi %126, %120 : vector<2x192xi1>
    %128 = vector.broadcast %116 : i32 to vector<2x192xi32>
    %129 = arith.addi %118, %128 : vector<2x192xi32>
    %130 = arith.select %127, %129, %118 : vector<2x192xi1>, vector<2x192xi32>
    %c32_i32 = arith.constant 32 : i32
    %131 = vector.broadcast %c32_i32 : i32 to vector<2x192xi32>
    %132 = arith.cmpi slt, %130, %131 : vector<2x192xi32>
    %cst_79 = arith.constant dense<0.000000e+00> : vector<2x192xf32>
    %133 = tpu.matmul %106, %112, %cst_79 {dimension_numbers = #tpu.dot_dimension_numbers<[1], [0], [0], [1], [0, 0, 1, 1], [], []>} : vector<2x64xf32>, vector<64x192xf32>, vector<2x192xf32> -> vector<2x192xf32>
    %134 = vector.extract_strided_slice %111 {offsets = [0, 0], sizes = [2, 192], strides = [1, 1]} : vector<16x192xf32> to vector<2x192xf32>
    %135 = vector.extract_strided_slice %111 {offsets = [14, 0], sizes = [2, 192], strides = [1, 1]} : vector<16x192xf32> to vector<2x192xf32>
    %136 = arith.select %132, %134, %135 : vector<2x192xi1>, vector<2x192xf32>
    %137 = vector.extract_strided_slice %136 {offsets = [0, 0], sizes = [2, 128], strides = [1, 1]} : vector<2x192xf32> to vector<2x128xf32>
    %138 = vector.extract_strided_slice %133 {offsets = [0, 0], sizes = [2, 128], strides = [1, 1]} : vector<2x192xf32> to vector<2x128xf32>
    %139 = arith.addf %137, %138 : vector<2x128xf32>
    %140 = arith.negf %139 : vector<2x128xf32>
    %141 = math.exp %140 : vector<2x128xf32>
    %cst_80 = arith.constant 1.000000e+00 : f32
    %142 = vector.broadcast %cst_80 : f32 to vector<2x128xf32>
    %143 = arith.addf %142, %141 : vector<2x128xf32>
    %144 = arith.divf %142, %143 : vector<2x128xf32>
    %145 = vector.extract_strided_slice %144 {offsets = [0, 0], sizes = [2, 64], strides = [1, 1]} : vector<2x128xf32> to vector<2x64xf32>
    %146 = vector.extract_strided_slice %144 {offsets = [0, 64], sizes = [2, 64], strides = [1, 1]} : vector<2x128xf32> to vector<2x64xf32>
    %147 = vector.extract_strided_slice %136 {offsets = [0, 128], sizes = [2, 64], strides = [1, 1]} : vector<2x192xf32> to vector<2x64xf32>
    %148 = vector.extract_strided_slice %133 {offsets = [0, 128], sizes = [2, 64], strides = [1, 1]} : vector<2x192xf32> to vector<2x64xf32>
    %149 = vector.broadcast %113 : vector<1x64xf32> to vector<2x64xf32>
    %150 = arith.addf %148, %149 : vector<2x64xf32>
    %151 = arith.mulf %145, %150 : vector<2x64xf32>
    %152 = arith.addf %147, %151 : vector<2x64xf32>
    %153 = math.tanh %152 : vector<2x64xf32>
    %cst_81 = arith.constant 1.000000e+00 : f32
    %154 = vector.broadcast %cst_81 : f32 to vector<2x64xf32>
    %155 = arith.subf %154, %146 : vector<2x64xf32>
    %156 = arith.mulf %155, %153 : vector<2x64xf32>
    %157 = arith.mulf %146, %106 : vector<2x64xf32>
    %158 = arith.addf %156, %157 : vector<2x64xf32>
    %159 = vector.extract_strided_slice %158 {offsets = [0, 0], sizes = [2, 32], strides = [1, 1]} : vector<2x64xf32> to vector<2x32xf32>
    %c0_82 = arith.constant 0 : index
    %c0_83 = arith.constant 0 : index
    %c0_84 = arith.constant 0 : index
    %160 = vector.load %arg28[%c0_82, %c0_83, %c0_84] : memref<8x2x64xf32, #tpu.memory_space<vmem>>, vector<1x2x32xf32>
    %161 = vector.shape_cast %160 : vector<1x2x32xf32> to vector<2x32xf32>
    %162 = vector.shape_cast %159 : vector<2x32xf32> to vector<1x2x32xf32>
    tpu.vector_store %arg28[%c0_82, %c0_83, %c0_84], %162 {strides = array<i32>} : memref<8x2x64xf32, #tpu.memory_space<vmem>>, vector<1x2x32xf32>,
    %163 = vector.extract_strided_slice %158 {offsets = [0, 32], sizes = [2, 32], strides = [1, 1]} : vector<2x64xf32> to vector<2x32xf32>
    %c7 = arith.constant 7 : index
    %c0_85 = arith.constant 0 : index
    %c32 = arith.constant 32 : index
    %164 = vector.load %arg28[%c7, %c0_85, %c32] : memref<8x2x64xf32, #tpu.memory_space<vmem>>, vector<1x2x32xf32>
    %165 = vector.shape_cast %164 : vector<1x2x32xf32> to vector<2x32xf32>
    %166 = vector.shape_cast %163 : vector<2x32xf32> to vector<1x2x32xf32>
    tpu.vector_store %arg28[%c7, %c0_85, %c32], %166 {strides = array<i32>} : memref<8x2x64xf32, #tpu.memory_space<vmem>>, vector<1x2x32xf32>,
    %cst_86 = arith.constant dense<0.000000e+00> : vector<2x192xf32>
    %167 = tpu.matmul %158, %112, %cst_86 {dimension_numbers = #tpu.dot_dimension_numbers<[1], [0], [0], [1], [0, 0, 1, 1], [], []>} : vector<2x64xf32>, vector<64x192xf32>, vector<2x192xf32> -> vector<2x192xf32>
    %168 = vector.extract_strided_slice %111 {offsets = [2, 0], sizes = [2, 192], strides = [1, 1]} : vector<16x192xf32> to vector<2x192xf32>
    %169 = vector.extract_strided_slice %111 {offsets = [12, 0], sizes = [2, 192], strides = [1, 1]} : vector<16x192xf32> to vector<2x192xf32>
    %170 = arith.select %132, %168, %169 : vector<2x192xi1>, vector<2x192xf32>
    %171 = vector.extract_strided_slice %170 {offsets = [0, 0], sizes = [2, 128], strides = [1, 1]} : vector<2x192xf32> to vector<2x128xf32>
    %172 = vector.extract_strided_slice %167 {offsets = [0, 0], sizes = [2, 128], strides = [1, 1]} : vector<2x192xf32> to vector<2x128xf32>
    %173 = arith.addf %171, %172 : vector<2x128xf32>
    %174 = arith.negf %173 : vector<2x128xf32>
    %175 = math.exp %174 : vector<2x128xf32>
    %cst_87 = arith.constant 1.000000e+00 : f32
    %176 = vector.broadcast %cst_87 : f32 to vector<2x128xf32>
    %177 = arith.addf %176, %175 : vector<2x128xf32>
    %178 = arith.divf %176, %177 : vector<2x128xf32>
    %179 = vector.extract_strided_slice %178 {offsets = [0, 0], sizes = [2, 64], strides = [1, 1]} : vector<2x128xf32> to vector<2x64xf32>
    %180 = vector.extract_strided_slice %178 {offsets = [0, 64], sizes = [2, 64], strides = [1, 1]} : vector<2x128xf32> to vector<2x64xf32>
    %181 = vector.extract_strided_slice %170 {offsets = [0, 128], sizes = [2, 64], strides = [1, 1]} : vector<2x192xf32> to vector<2x64xf32>
    %182 = vector.extract_strided_slice %167 {offsets = [0, 128], sizes = [2, 64], strides = [1, 1]} : vector<2x192xf32> to vector<2x64xf32>
    %183 = vector.broadcast %113 : vector<1x64xf32> to vector<2x64xf32>
    %184 = arith.addf %182, %183 : vector<2x64xf32>
    %185 = arith.mulf %179, %184 : vector<2x64xf32>
    %186 = arith.addf %181, %185 : vector<2x64xf32>
    %187 = math.tanh %186 : vector<2x64xf32>
    %cst_88 = arith.constant 1.000000e+00 : f32
    %188 = vector.broadcast %cst_88 : f32 to vector<2x64xf32>
    %189 = arith.subf %188, %180 : vector<2x64xf32>
    %190 = arith.mulf %189, %187 : vector<2x64xf32>
    %191 = arith.mulf %180, %158 : vector<2x64xf32>
    %192 = arith.addf %190, %191 : vector<2x64xf32>
    %193 = vector.extract_strided_slice %192 {offsets = [0, 0], sizes = [2, 32], strides = [1, 1]} : vector<2x64xf32> to vector<2x32xf32>
    %c1 = arith.constant 1 : index
    %c0_89 = arith.constant 0 : index
    %c0_90 = arith.constant 0 : index
    %194 = vector.load %arg28[%c1, %c0_89, %c0_90] : memref<8x2x64xf32, #tpu.memory_space<vmem>>, vector<1x2x32xf32>
    %195 = vector.shape_cast %194 : vector<1x2x32xf32> to vector<2x32xf32>
    %196 = vector.shape_cast %193 : vector<2x32xf32> to vector<1x2x32xf32>
    tpu.vector_store %arg28[%c1, %c0_89, %c0_90], %196 {strides = array<i32>} : memref<8x2x64xf32, #tpu.memory_space<vmem>>, vector<1x2x32xf32>,
    %197 = vector.extract_strided_slice %192 {offsets = [0, 32], sizes = [2, 32], strides = [1, 1]} : vector<2x64xf32> to vector<2x32xf32>
    %c6 = arith.constant 6 : index
    %c0_91 = arith.constant 0 : index
    %c32_92 = arith.constant 32 : index
    %198 = vector.load %arg28[%c6, %c0_91, %c32_92] : memref<8x2x64xf32, #tpu.memory_space<vmem>>, vector<1x2x32xf32>
    %199 = vector.shape_cast %198 : vector<1x2x32xf32> to vector<2x32xf32>
    %200 = vector.shape_cast %197 : vector<2x32xf32> to vector<1x2x32xf32>
    tpu.vector_store %arg28[%c6, %c0_91, %c32_92], %200 {strides = array<i32>} : memref<8x2x64xf32, #tpu.memory_space<vmem>>, vector<1x2x32xf32>,
    %cst_93 = arith.constant dense<0.000000e+00> : vector<2x192xf32>
    %201 = tpu.matmul %192, %112, %cst_93 {dimension_numbers = #tpu.dot_dimension_numbers<[1], [0], [0], [1], [0, 0, 1, 1], [], []>} : vector<2x64xf32>, vector<64x192xf32>, vector<2x192xf32> -> vector<2x192xf32>
    %202 = vector.extract_strided_slice %111 {offsets = [4, 0], sizes = [2, 192], strides = [1, 1]} : vector<16x192xf32> to vector<2x192xf32>
    %203 = vector.extract_strided_slice %111 {offsets = [10, 0], sizes = [2, 192], strides = [1, 1]} : vector<16x192xf32> to vector<2x192xf32>
    %204 = arith.select %132, %202, %203 : vector<2x192xi1>, vector<2x192xf32>
    %205 = vector.extract_strided_slice %204 {offsets = [0, 0], sizes = [2, 128], strides = [1, 1]} : vector<2x192xf32> to vector<2x128xf32>
    %206 = vector.extract_strided_slice %201 {offsets = [0, 0], sizes = [2, 128], strides = [1, 1]} : vector<2x192xf32> to vector<2x128xf32>
    %207 = arith.addf %205, %206 : vector<2x128xf32>
    %208 = arith.negf %207 : vector<2x128xf32>
    %209 = math.exp %208 : vector<2x128xf32>
    %cst_94 = arith.constant 1.000000e+00 : f32
    %210 = vector.broadcast %cst_94 : f32 to vector<2x128xf32>
    %211 = arith.addf %210, %209 : vector<2x128xf32>
    %212 = arith.divf %210, %211 : vector<2x128xf32>
    %213 = vector.extract_strided_slice %212 {offsets = [0, 0], sizes = [2, 64], strides = [1, 1]} : vector<2x128xf32> to vector<2x64xf32>
    %214 = vector.extract_strided_slice %212 {offsets = [0, 64], sizes = [2, 64], strides = [1, 1]} : vector<2x128xf32> to vector<2x64xf32>
    %215 = vector.extract_strided_slice %204 {offsets = [0, 128], sizes = [2, 64], strides = [1, 1]} : vector<2x192xf32> to vector<2x64xf32>
    %216 = vector.extract_strided_slice %201 {offsets = [0, 128], sizes = [2, 64], strides = [1, 1]} : vector<2x192xf32> to vector<2x64xf32>
    %217 = vector.broadcast %113 : vector<1x64xf32> to vector<2x64xf32>
    %218 = arith.addf %216, %217 : vector<2x64xf32>
    %219 = arith.mulf %213, %218 : vector<2x64xf32>
    %220 = arith.addf %215, %219 : vector<2x64xf32>
    %221 = math.tanh %220 : vector<2x64xf32>
    %cst_95 = arith.constant 1.000000e+00 : f32
    %222 = vector.broadcast %cst_95 : f32 to vector<2x64xf32>
    %223 = arith.subf %222, %214 : vector<2x64xf32>
    %224 = arith.mulf %223, %221 : vector<2x64xf32>
    %225 = arith.mulf %214, %192 : vector<2x64xf32>
    %226 = arith.addf %224, %225 : vector<2x64xf32>
    %227 = vector.extract_strided_slice %226 {offsets = [0, 0], sizes = [2, 32], strides = [1, 1]} : vector<2x64xf32> to vector<2x32xf32>
    %c2 = arith.constant 2 : index
    %c0_96 = arith.constant 0 : index
    %c0_97 = arith.constant 0 : index
    %228 = vector.load %arg28[%c2, %c0_96, %c0_97] : memref<8x2x64xf32, #tpu.memory_space<vmem>>, vector<1x2x32xf32>
    %229 = vector.shape_cast %228 : vector<1x2x32xf32> to vector<2x32xf32>
    %230 = vector.shape_cast %227 : vector<2x32xf32> to vector<1x2x32xf32>
    tpu.vector_store %arg28[%c2, %c0_96, %c0_97], %230 {strides = array<i32>} : memref<8x2x64xf32, #tpu.memory_space<vmem>>, vector<1x2x32xf32>,
    %231 = vector.extract_strided_slice %226 {offsets = [0, 32], sizes = [2, 32], strides = [1, 1]} : vector<2x64xf32> to vector<2x32xf32>
    %c5 = arith.constant 5 : index
    %c0_98 = arith.constant 0 : index
    %c32_99 = arith.constant 32 : index
    %232 = vector.load %arg28[%c5, %c0_98, %c32_99] : memref<8x2x64xf32, #tpu.memory_space<vmem>>, vector<1x2x32xf32>
    %233 = vector.shape_cast %232 : vector<1x2x32xf32> to vector<2x32xf32>
    %234 = vector.shape_cast %231 : vector<2x32xf32> to vector<1x2x32xf32>
    tpu.vector_store %arg28[%c5, %c0_98, %c32_99], %234 {strides = array<i32>} : memref<8x2x64xf32, #tpu.memory_space<vmem>>, vector<1x2x32xf32>,
    %cst_100 = arith.constant dense<0.000000e+00> : vector<2x192xf32>
    %235 = tpu.matmul %226, %112, %cst_100 {dimension_numbers = #tpu.dot_dimension_numbers<[1], [0], [0], [1], [0, 0, 1, 1], [], []>} : vector<2x64xf32>, vector<64x192xf32>, vector<2x192xf32> -> vector<2x192xf32>
    %236 = vector.extract_strided_slice %111 {offsets = [6, 0], sizes = [2, 192], strides = [1, 1]} : vector<16x192xf32> to vector<2x192xf32>
    %237 = vector.extract_strided_slice %111 {offsets = [8, 0], sizes = [2, 192], strides = [1, 1]} : vector<16x192xf32> to vector<2x192xf32>
    %238 = arith.select %132, %236, %237 : vector<2x192xi1>, vector<2x192xf32>
    %239 = vector.extract_strided_slice %238 {offsets = [0, 0], sizes = [2, 128], strides = [1, 1]} : vector<2x192xf32> to vector<2x128xf32>
    %240 = vector.extract_strided_slice %235 {offsets = [0, 0], sizes = [2, 128], strides = [1, 1]} : vector<2x192xf32> to vector<2x128xf32>
    %241 = arith.addf %239, %240 : vector<2x128xf32>
    %242 = arith.negf %241 : vector<2x128xf32>
    %243 = math.exp %242 : vector<2x128xf32>
    %cst_101 = arith.constant 1.000000e+00 : f32
    %244 = vector.broadcast %cst_101 : f32 to vector<2x128xf32>
    %245 = arith.addf %244, %243 : vector<2x128xf32>
    %246 = arith.divf %244, %245 : vector<2x128xf32>
    %247 = vector.extract_strided_slice %246 {offsets = [0, 0], sizes = [2, 64], strides = [1, 1]} : vector<2x128xf32> to vector<2x64xf32>
    %248 = vector.extract_strided_slice %246 {offsets = [0, 64], sizes = [2, 64], strides = [1, 1]} : vector<2x128xf32> to vector<2x64xf32>
    %249 = vector.extract_strided_slice %238 {offsets = [0, 128], sizes = [2, 64], strides = [1, 1]} : vector<2x192xf32> to vector<2x64xf32>
    %250 = vector.extract_strided_slice %235 {offsets = [0, 128], sizes = [2, 64], strides = [1, 1]} : vector<2x192xf32> to vector<2x64xf32>
    %251 = vector.broadcast %113 : vector<1x64xf32> to vector<2x64xf32>
    %252 = arith.addf %250, %251 : vector<2x64xf32>
    %253 = arith.mulf %247, %252 : vector<2x64xf32>
    %254 = arith.addf %249, %253 : vector<2x64xf32>
    %255 = math.tanh %254 : vector<2x64xf32>
    %cst_102 = arith.constant 1.000000e+00 : f32
    %256 = vector.broadcast %cst_102 : f32 to vector<2x64xf32>
    %257 = arith.subf %256, %248 : vector<2x64xf32>
    %258 = arith.mulf %257, %255 : vector<2x64xf32>
    %259 = arith.mulf %248, %226 : vector<2x64xf32>
    %260 = arith.addf %258, %259 : vector<2x64xf32>
    %261 = vector.extract_strided_slice %260 {offsets = [0, 0], sizes = [2, 32], strides = [1, 1]} : vector<2x64xf32> to vector<2x32xf32>
    %c3 = arith.constant 3 : index
    %c0_103 = arith.constant 0 : index
    %c0_104 = arith.constant 0 : index
    %262 = vector.load %arg28[%c3, %c0_103, %c0_104] : memref<8x2x64xf32, #tpu.memory_space<vmem>>, vector<1x2x32xf32>
    %263 = vector.shape_cast %262 : vector<1x2x32xf32> to vector<2x32xf32>
    %264 = vector.shape_cast %261 : vector<2x32xf32> to vector<1x2x32xf32>
    tpu.vector_store %arg28[%c3, %c0_103, %c0_104], %264 {strides = array<i32>} : memref<8x2x64xf32, #tpu.memory_space<vmem>>, vector<1x2x32xf32>,
    %265 = vector.extract_strided_slice %260 {offsets = [0, 32], sizes = [2, 32], strides = [1, 1]} : vector<2x64xf32> to vector<2x32xf32>
    %c4 = arith.constant 4 : index
    %c0_105 = arith.constant 0 : index
    %c32_106 = arith.constant 32 : index
    %266 = vector.load %arg28[%c4, %c0_105, %c32_106] : memref<8x2x64xf32, #tpu.memory_space<vmem>>, vector<1x2x32xf32>
    %267 = vector.shape_cast %266 : vector<1x2x32xf32> to vector<2x32xf32>
    %268 = vector.shape_cast %265 : vector<2x32xf32> to vector<1x2x32xf32>
    tpu.vector_store %arg28[%c4, %c0_105, %c32_106], %268 {strides = array<i32>} : memref<8x2x64xf32, #tpu.memory_space<vmem>>, vector<1x2x32xf32>,
    %cst_107 = arith.constant dense<0.000000e+00> : vector<2x192xf32>
    %269 = tpu.matmul %260, %112, %cst_107 {dimension_numbers = #tpu.dot_dimension_numbers<[1], [0], [0], [1], [0, 0, 1, 1], [], []>} : vector<2x64xf32>, vector<64x192xf32>, vector<2x192xf32> -> vector<2x192xf32>
    %270 = vector.extract_strided_slice %111 {offsets = [8, 0], sizes = [2, 192], strides = [1, 1]} : vector<16x192xf32> to vector<2x192xf32>
    %271 = vector.extract_strided_slice %111 {offsets = [6, 0], sizes = [2, 192], strides = [1, 1]} : vector<16x192xf32> to vector<2x192xf32>
    %272 = arith.select %132, %270, %271 : vector<2x192xi1>, vector<2x192xf32>
    %273 = vector.extract_strided_slice %272 {offsets = [0, 0], sizes = [2, 128], strides = [1, 1]} : vector<2x192xf32> to vector<2x128xf32>
    %274 = vector.extract_strided_slice %269 {offsets = [0, 0], sizes = [2, 128], strides = [1, 1]} : vector<2x192xf32> to vector<2x128xf32>
    %275 = arith.addf %273, %274 : vector<2x128xf32>
    %276 = arith.negf %275 : vector<2x128xf32>
    %277 = math.exp %276 : vector<2x128xf32>
    %cst_108 = arith.constant 1.000000e+00 : f32
    %278 = vector.broadcast %cst_108 : f32 to vector<2x128xf32>
    %279 = arith.addf %278, %277 : vector<2x128xf32>
    %280 = arith.divf %278, %279 : vector<2x128xf32>
    %281 = vector.extract_strided_slice %280 {offsets = [0, 0], sizes = [2, 64], strides = [1, 1]} : vector<2x128xf32> to vector<2x64xf32>
    %282 = vector.extract_strided_slice %280 {offsets = [0, 64], sizes = [2, 64], strides = [1, 1]} : vector<2x128xf32> to vector<2x64xf32>
    %283 = vector.extract_strided_slice %272 {offsets = [0, 128], sizes = [2, 64], strides = [1, 1]} : vector<2x192xf32> to vector<2x64xf32>
    %284 = vector.extract_strided_slice %269 {offsets = [0, 128], sizes = [2, 64], strides = [1, 1]} : vector<2x192xf32> to vector<2x64xf32>
    %285 = vector.broadcast %113 : vector<1x64xf32> to vector<2x64xf32>
    %286 = arith.addf %284, %285 : vector<2x64xf32>
    %287 = arith.mulf %281, %286 : vector<2x64xf32>
    %288 = arith.addf %283, %287 : vector<2x64xf32>
    %289 = math.tanh %288 : vector<2x64xf32>
    %cst_109 = arith.constant 1.000000e+00 : f32
    %290 = vector.broadcast %cst_109 : f32 to vector<2x64xf32>
    %291 = arith.subf %290, %282 : vector<2x64xf32>
    %292 = arith.mulf %291, %289 : vector<2x64xf32>
    %293 = arith.mulf %282, %260 : vector<2x64xf32>
    %294 = arith.addf %292, %293 : vector<2x64xf32>
    %295 = vector.extract_strided_slice %294 {offsets = [0, 0], sizes = [2, 32], strides = [1, 1]} : vector<2x64xf32> to vector<2x32xf32>
    %c4_110 = arith.constant 4 : index
    %c0_111 = arith.constant 0 : index
    %c0_112 = arith.constant 0 : index
    %296 = vector.load %arg28[%c4_110, %c0_111, %c0_112] : memref<8x2x64xf32, #tpu.memory_space<vmem>>, vector<1x2x32xf32>
    %297 = vector.shape_cast %296 : vector<1x2x32xf32> to vector<2x32xf32>
    %298 = vector.shape_cast %295 : vector<2x32xf32> to vector<1x2x32xf32>
    tpu.vector_store %arg28[%c4_110, %c0_111, %c0_112], %298 {strides = array<i32>} : memref<8x2x64xf32, #tpu.memory_space<vmem>>, vector<1x2x32xf32>,
    %299 = vector.extract_strided_slice %294 {offsets = [0, 32], sizes = [2, 32], strides = [1, 1]} : vector<2x64xf32> to vector<2x32xf32>
    %c3_113 = arith.constant 3 : index
    %c0_114 = arith.constant 0 : index
    %c32_115 = arith.constant 32 : index
    %300 = vector.load %arg28[%c3_113, %c0_114, %c32_115] : memref<8x2x64xf32, #tpu.memory_space<vmem>>, vector<1x2x32xf32>
    %301 = vector.shape_cast %300 : vector<1x2x32xf32> to vector<2x32xf32>
    %302 = vector.shape_cast %299 : vector<2x32xf32> to vector<1x2x32xf32>
    tpu.vector_store %arg28[%c3_113, %c0_114, %c32_115], %302 {strides = array<i32>} : memref<8x2x64xf32, #tpu.memory_space<vmem>>, vector<1x2x32xf32>,
    %cst_116 = arith.constant dense<0.000000e+00> : vector<2x192xf32>
    %303 = tpu.matmul %294, %112, %cst_116 {dimension_numbers = #tpu.dot_dimension_numbers<[1], [0], [0], [1], [0, 0, 1, 1], [], []>} : vector<2x64xf32>, vector<64x192xf32>, vector<2x192xf32> -> vector<2x192xf32>
    %304 = vector.extract_strided_slice %111 {offsets = [10, 0], sizes = [2, 192], strides = [1, 1]} : vector<16x192xf32> to vector<2x192xf32>
    %305 = vector.extract_strided_slice %111 {offsets = [4, 0], sizes = [2, 192], strides = [1, 1]} : vector<16x192xf32> to vector<2x192xf32>
    %306 = arith.select %132, %304, %305 : vector<2x192xi1>, vector<2x192xf32>
    %307 = vector.extract_strided_slice %306 {offsets = [0, 0], sizes = [2, 128], strides = [1, 1]} : vector<2x192xf32> to vector<2x128xf32>
    %308 = vector.extract_strided_slice %303 {offsets = [0, 0], sizes = [2, 128], strides = [1, 1]} : vector<2x192xf32> to vector<2x128xf32>
    %309 = arith.addf %307, %308 : vector<2x128xf32>
    %310 = arith.negf %309 : vector<2x128xf32>
    %311 = math.exp %310 : vector<2x128xf32>
    %cst_117 = arith.constant 1.000000e+00 : f32
    %312 = vector.broadcast %cst_117 : f32 to vector<2x128xf32>
    %313 = arith.addf %312, %311 : vector<2x128xf32>
    %314 = arith.divf %312, %313 : vector<2x128xf32>
    %315 = vector.extract_strided_slice %314 {offsets = [0, 0], sizes = [2, 64], strides = [1, 1]} : vector<2x128xf32> to vector<2x64xf32>
    %316 = vector.extract_strided_slice %314 {offsets = [0, 64], sizes = [2, 64], strides = [1, 1]} : vector<2x128xf32> to vector<2x64xf32>
    %317 = vector.extract_strided_slice %306 {offsets = [0, 128], sizes = [2, 64], strides = [1, 1]} : vector<2x192xf32> to vector<2x64xf32>
    %318 = vector.extract_strided_slice %303 {offsets = [0, 128], sizes = [2, 64], strides = [1, 1]} : vector<2x192xf32> to vector<2x64xf32>
    %319 = vector.broadcast %113 : vector<1x64xf32> to vector<2x64xf32>
    %320 = arith.addf %318, %319 : vector<2x64xf32>
    %321 = arith.mulf %315, %320 : vector<2x64xf32>
    %322 = arith.addf %317, %321 : vector<2x64xf32>
    %323 = math.tanh %322 : vector<2x64xf32>
    %cst_118 = arith.constant 1.000000e+00 : f32
    %324 = vector.broadcast %cst_118 : f32 to vector<2x64xf32>
    %325 = arith.subf %324, %316 : vector<2x64xf32>
    %326 = arith.mulf %325, %323 : vector<2x64xf32>
    %327 = arith.mulf %316, %294 : vector<2x64xf32>
    %328 = arith.addf %326, %327 : vector<2x64xf32>
    %329 = vector.extract_strided_slice %328 {offsets = [0, 0], sizes = [2, 32], strides = [1, 1]} : vector<2x64xf32> to vector<2x32xf32>
    %c5_119 = arith.constant 5 : index
    %c0_120 = arith.constant 0 : index
    %c0_121 = arith.constant 0 : index
    %330 = vector.load %arg28[%c5_119, %c0_120, %c0_121] : memref<8x2x64xf32, #tpu.memory_space<vmem>>, vector<1x2x32xf32>
    %331 = vector.shape_cast %330 : vector<1x2x32xf32> to vector<2x32xf32>
    %332 = vector.shape_cast %329 : vector<2x32xf32> to vector<1x2x32xf32>
    tpu.vector_store %arg28[%c5_119, %c0_120, %c0_121], %332 {strides = array<i32>} : memref<8x2x64xf32, #tpu.memory_space<vmem>>, vector<1x2x32xf32>,
    %333 = vector.extract_strided_slice %328 {offsets = [0, 32], sizes = [2, 32], strides = [1, 1]} : vector<2x64xf32> to vector<2x32xf32>
    %c2_122 = arith.constant 2 : index
    %c0_123 = arith.constant 0 : index
    %c32_124 = arith.constant 32 : index
    %334 = vector.load %arg28[%c2_122, %c0_123, %c32_124] : memref<8x2x64xf32, #tpu.memory_space<vmem>>, vector<1x2x32xf32>
    %335 = vector.shape_cast %334 : vector<1x2x32xf32> to vector<2x32xf32>
    %336 = vector.shape_cast %333 : vector<2x32xf32> to vector<1x2x32xf32>
    tpu.vector_store %arg28[%c2_122, %c0_123, %c32_124], %336 {strides = array<i32>} : memref<8x2x64xf32, #tpu.memory_space<vmem>>, vector<1x2x32xf32>,
    %cst_125 = arith.constant dense<0.000000e+00> : vector<2x192xf32>
    %337 = tpu.matmul %328, %112, %cst_125 {dimension_numbers = #tpu.dot_dimension_numbers<[1], [0], [0], [1], [0, 0, 1, 1], [], []>} : vector<2x64xf32>, vector<64x192xf32>, vector<2x192xf32> -> vector<2x192xf32>
    %338 = vector.extract_strided_slice %111 {offsets = [12, 0], sizes = [2, 192], strides = [1, 1]} : vector<16x192xf32> to vector<2x192xf32>
    %339 = vector.extract_strided_slice %111 {offsets = [2, 0], sizes = [2, 192], strides = [1, 1]} : vector<16x192xf32> to vector<2x192xf32>
    %340 = arith.select %132, %338, %339 : vector<2x192xi1>, vector<2x192xf32>
    %341 = vector.extract_strided_slice %340 {offsets = [0, 0], sizes = [2, 128], strides = [1, 1]} : vector<2x192xf32> to vector<2x128xf32>
    %342 = vector.extract_strided_slice %337 {offsets = [0, 0], sizes = [2, 128], strides = [1, 1]} : vector<2x192xf32> to vector<2x128xf32>
    %343 = arith.addf %341, %342 : vector<2x128xf32>
    %344 = arith.negf %343 : vector<2x128xf32>
    %345 = math.exp %344 : vector<2x128xf32>
    %cst_126 = arith.constant 1.000000e+00 : f32
    %346 = vector.broadcast %cst_126 : f32 to vector<2x128xf32>
    %347 = arith.addf %346, %345 : vector<2x128xf32>
    %348 = arith.divf %346, %347 : vector<2x128xf32>
    %349 = vector.extract_strided_slice %348 {offsets = [0, 0], sizes = [2, 64], strides = [1, 1]} : vector<2x128xf32> to vector<2x64xf32>
    %350 = vector.extract_strided_slice %348 {offsets = [0, 64], sizes = [2, 64], strides = [1, 1]} : vector<2x128xf32> to vector<2x64xf32>
    %351 = vector.extract_strided_slice %340 {offsets = [0, 128], sizes = [2, 64], strides = [1, 1]} : vector<2x192xf32> to vector<2x64xf32>
    %352 = vector.extract_strided_slice %337 {offsets = [0, 128], sizes = [2, 64], strides = [1, 1]} : vector<2x192xf32> to vector<2x64xf32>
    %353 = vector.broadcast %113 : vector<1x64xf32> to vector<2x64xf32>
    %354 = arith.addf %352, %353 : vector<2x64xf32>
    %355 = arith.mulf %349, %354 : vector<2x64xf32>
    %356 = arith.addf %351, %355 : vector<2x64xf32>
    %357 = math.tanh %356 : vector<2x64xf32>
    %cst_127 = arith.constant 1.000000e+00 : f32
    %358 = vector.broadcast %cst_127 : f32 to vector<2x64xf32>
    %359 = arith.subf %358, %350 : vector<2x64xf32>
    %360 = arith.mulf %359, %357 : vector<2x64xf32>
    %361 = arith.mulf %350, %328 : vector<2x64xf32>
    %362 = arith.addf %360, %361 : vector<2x64xf32>
    %363 = vector.extract_strided_slice %362 {offsets = [0, 0], sizes = [2, 32], strides = [1, 1]} : vector<2x64xf32> to vector<2x32xf32>
    %c6_128 = arith.constant 6 : index
    %c0_129 = arith.constant 0 : index
    %c0_130 = arith.constant 0 : index
    %364 = vector.load %arg28[%c6_128, %c0_129, %c0_130] : memref<8x2x64xf32, #tpu.memory_space<vmem>>, vector<1x2x32xf32>
    %365 = vector.shape_cast %364 : vector<1x2x32xf32> to vector<2x32xf32>
    %366 = vector.shape_cast %363 : vector<2x32xf32> to vector<1x2x32xf32>
    tpu.vector_store %arg28[%c6_128, %c0_129, %c0_130], %366 {strides = array<i32>} : memref<8x2x64xf32, #tpu.memory_space<vmem>>, vector<1x2x32xf32>,
    %367 = vector.extract_strided_slice %362 {offsets = [0, 32], sizes = [2, 32], strides = [1, 1]} : vector<2x64xf32> to vector<2x32xf32>
    %c1_131 = arith.constant 1 : index
    %c0_132 = arith.constant 0 : index
    %c32_133 = arith.constant 32 : index
    %368 = vector.load %arg28[%c1_131, %c0_132, %c32_133] : memref<8x2x64xf32, #tpu.memory_space<vmem>>, vector<1x2x32xf32>
    %369 = vector.shape_cast %368 : vector<1x2x32xf32> to vector<2x32xf32>
    %370 = vector.shape_cast %367 : vector<2x32xf32> to vector<1x2x32xf32>
    tpu.vector_store %arg28[%c1_131, %c0_132, %c32_133], %370 {strides = array<i32>} : memref<8x2x64xf32, #tpu.memory_space<vmem>>, vector<1x2x32xf32>,
    %cst_134 = arith.constant dense<0.000000e+00> : vector<2x192xf32>
    %371 = tpu.matmul %362, %112, %cst_134 {dimension_numbers = #tpu.dot_dimension_numbers<[1], [0], [0], [1], [0, 0, 1, 1], [], []>} : vector<2x64xf32>, vector<64x192xf32>, vector<2x192xf32> -> vector<2x192xf32>
    %372 = vector.extract_strided_slice %111 {offsets = [14, 0], sizes = [2, 192], strides = [1, 1]} : vector<16x192xf32> to vector<2x192xf32>
    %373 = vector.extract_strided_slice %111 {offsets = [0, 0], sizes = [2, 192], strides = [1, 1]} : vector<16x192xf32> to vector<2x192xf32>
    %374 = arith.select %132, %372, %373 : vector<2x192xi1>, vector<2x192xf32>
    %375 = vector.extract_strided_slice %374 {offsets = [0, 0], sizes = [2, 128], strides = [1, 1]} : vector<2x192xf32> to vector<2x128xf32>
    %376 = vector.extract_strided_slice %371 {offsets = [0, 0], sizes = [2, 128], strides = [1, 1]} : vector<2x192xf32> to vector<2x128xf32>
    %377 = arith.addf %375, %376 : vector<2x128xf32>
    %378 = arith.negf %377 : vector<2x128xf32>
    %379 = math.exp %378 : vector<2x128xf32>
    %cst_135 = arith.constant 1.000000e+00 : f32
    %380 = vector.broadcast %cst_135 : f32 to vector<2x128xf32>
    %381 = arith.addf %380, %379 : vector<2x128xf32>
    %382 = arith.divf %380, %381 : vector<2x128xf32>
    %383 = vector.extract_strided_slice %382 {offsets = [0, 0], sizes = [2, 64], strides = [1, 1]} : vector<2x128xf32> to vector<2x64xf32>
    %384 = vector.extract_strided_slice %382 {offsets = [0, 64], sizes = [2, 64], strides = [1, 1]} : vector<2x128xf32> to vector<2x64xf32>
    %385 = vector.extract_strided_slice %374 {offsets = [0, 128], sizes = [2, 64], strides = [1, 1]} : vector<2x192xf32> to vector<2x64xf32>
    %386 = vector.extract_strided_slice %371 {offsets = [0, 128], sizes = [2, 64], strides = [1, 1]} : vector<2x192xf32> to vector<2x64xf32>
    %387 = vector.broadcast %113 : vector<1x64xf32> to vector<2x64xf32>
    %388 = arith.addf %386, %387 : vector<2x64xf32>
    %389 = arith.mulf %383, %388 : vector<2x64xf32>
    %390 = arith.addf %385, %389 : vector<2x64xf32>
    %391 = math.tanh %390 : vector<2x64xf32>
    %cst_136 = arith.constant 1.000000e+00 : f32
    %392 = vector.broadcast %cst_136 : f32 to vector<2x64xf32>
    %393 = arith.subf %392, %384 : vector<2x64xf32>
    %394 = arith.mulf %393, %391 : vector<2x64xf32>
    %395 = arith.mulf %384, %362 : vector<2x64xf32>
    %396 = arith.addf %394, %395 : vector<2x64xf32>
    %397 = vector.extract_strided_slice %396 {offsets = [0, 0], sizes = [2, 32], strides = [1, 1]} : vector<2x64xf32> to vector<2x32xf32>
    %c7_137 = arith.constant 7 : index
    %c0_138 = arith.constant 0 : index
    %c0_139 = arith.constant 0 : index
    %398 = vector.load %arg28[%c7_137, %c0_138, %c0_139] : memref<8x2x64xf32, #tpu.memory_space<vmem>>, vector<1x2x32xf32>
    %399 = vector.shape_cast %398 : vector<1x2x32xf32> to vector<2x32xf32>
    %400 = vector.shape_cast %397 : vector<2x32xf32> to vector<1x2x32xf32>
    tpu.vector_store %arg28[%c7_137, %c0_138, %c0_139], %400 {strides = array<i32>} : memref<8x2x64xf32, #tpu.memory_space<vmem>>, vector<1x2x32xf32>,
    %401 = vector.extract_strided_slice %396 {offsets = [0, 32], sizes = [2, 32], strides = [1, 1]} : vector<2x64xf32> to vector<2x32xf32>
    %c0_140 = arith.constant 0 : index
    %c0_141 = arith.constant 0 : index
    %c32_142 = arith.constant 32 : index
    %402 = vector.load %arg28[%c0_140, %c0_141, %c32_142] : memref<8x2x64xf32, #tpu.memory_space<vmem>>, vector<1x2x32xf32>
    %403 = vector.shape_cast %402 : vector<1x2x32xf32> to vector<2x32xf32>
    %404 = vector.shape_cast %401 : vector<2x32xf32> to vector<1x2x32xf32>
    tpu.vector_store %arg28[%c0_140, %c0_141, %c32_142], %404 {strides = array<i32>} : memref<8x2x64xf32, #tpu.memory_space<vmem>>, vector<1x2x32xf32>,
    %c0_143 = arith.constant 0 : index
    %c0_144 = arith.constant 0 : index
    %405 = vector.load %arg26[%c0_143, %c0_144] : memref<64x32xf32, #tpu.memory_space<vmem>>, vector<64x32xf32>
    %cst_145 = arith.constant dense<0.000000e+00> : vector<2x32xf32>
    %406 = tpu.matmul %396, %405, %cst_145 {dimension_numbers = #tpu.dot_dimension_numbers<[1], [0], [0], [1], [0, 0, 1, 1], [], []>} : vector<2x64xf32>, vector<64x32xf32>, vector<2x32xf32> -> vector<2x32xf32>
    %c0_146 = arith.constant 0 : index
    %c0_147 = arith.constant 0 : index
    %407 = vector.load %arg27[%c0_146, %c0_147] : memref<1x32xf32, #tpu.memory_space<vmem>>, vector<1x32xf32>
    %408 = vector.broadcast %407 : vector<1x32xf32> to vector<2x32xf32>
    %409 = arith.addf %406, %408 : vector<2x32xf32>
    %cst_148 = arith.constant 0.000000e+00 : f32
    %410 = vector.broadcast %cst_148 : f32 to vector<2x32xf32>
    %411 = arith.maximumf %409, %410 : vector<2x32xf32>
    %c0_149 = arith.constant 0 : index
    %c0_150 = arith.constant 0 : index
    %412 = vector.load %arg29[%c0_149, %c0_150] : memref<2x32xf32, #tpu.memory_space<vmem>>, vector<2x32xf32>
    tpu.vector_store %arg29[%c0_149, %c0_150], %411 {strides = array<i32>} : memref<2x32xf32, #tpu.memory_space<vmem>>, vector<2x32xf32>,
    return
  }
}

</mosaic_0001>

<bundles_post_ra>
// kernel: encoder_forward.1
= control target key start
LH: loop header
LB: loop body
LE: loop exit
PB: predicated region body
PF: predicated region fallthrough
CT: control target
= control target key end

     0   :  { %s2648_s6 = smov 1   ;;  %s2649_s10 = smov 2   ;;  %s3190_s0 = inlined_call_operand.smem [shape: u32[30], index: -1, kind: input, shape index: {}] }
   0x1   :  { %s2694_s5 = sld [smem:[%s3190_s0]]   ;;  %s2650_s14 = smov 3  }
   0x2   :  { %s2699_s9 = sld [smem:[%s3190_s0 + %s2648_s6]]   ;;  %s2651_s18 = smov 4  }
   0x3   :  { %s2704_s13 = sld [smem:[%s3190_s0 + %s2649_s10]]   ;;  %s2652_s22 = smov 5  }
   0x4   :  { %s2709_s17 = sld [smem:[%s3190_s0 + %s2650_s14]]   ;;  %s2653_s26 = smov 6  }
   0x5   :  { %s2714_s21 = sld [smem:[%s3190_s0 + %s2651_s18]]   ;;  %s2654_s30 = smov 7  }
   0x6   :  { %s2719_s25 = sld [smem:[%s3190_s0 + %s2652_s22]]   ;;  %s2655_s4 = smov 8  }
   0x7   :  { %s2724_s29 = sld [smem:[%s3190_s0 + %s2653_s26]]   ;;  %s2656_s10 = smov 9  }
   0x8   :  { %s2729_s3 = sld [smem:[%s3190_s0 + %s2654_s30]]   ;;  %s2657_s15 = smov 10  }
   0x9   :  { %s2734_s8 = sld [smem:[%s3190_s0 + %s2655_s4]]   ;;  %s2658_s20 = smov 11  }
   0xa   :  { %s2739_s14 = sld [smem:[%s3190_s0 + %s2656_s10]]   ;;  %s2659_s26 = smov 12  }
   0xb   :  { %s2744_s19 = sld [smem:[%s3190_s0 + %s2657_s15]]   ;;  %s2660_s1 = smov 13  }
   0xc   :  { %s2749_s24 = sld [smem:[%s3190_s0 + %s2658_s20]]   ;;  %s2661_s7 = smov 14  }
   0xd   :  { %s2754_s30 = sld [smem:[%s3190_s0 + %s2659_s26]]   ;;  %s2662_s15 = smov 15  }
   0xe   :  { %s2759_s6 = sld [smem:[%s3190_s0 + %s2660_s1]]   ;;  %s2663_s22 = smov 16  }
   0xf   :  { %s2764_s12 = sld [smem:[%s3190_s0 + %s2661_s7]]   ;;  %s2664_s28 = smov 17  }
  0x10   :  { %s2769_s20 = sld [smem:[%s3190_s0 + %s2662_s15]]   ;;  %s2665_s7 = smov 18  }
  0x11   :  { %3194 = sst [smem:[#allocation8_spill]] %s2744_s19  ;;  %s2666_s15 = smov 19  }
  0x12   :  { %3195 = sst [smem:[#allocation9_spill]] %s2749_s24 }
  0x13   :  { %s2774_s27 = sld [smem:[%s3190_s0 + %s2663_s22]]   ;;  %s2667_s22 = smov 20  }
  0x14   :  { %s2779_s4 = sld [smem:[%s3190_s0 + %s2664_s28]]   ;;  %s2668_s28 = smov 21  }
  0x15   :  { %s2784_s24 = sld [smem:[%s3190_s0 + %s2665_s7]]   ;;  %s2669_s7 = smov 22  }
  0x16   :  { %3196 = sst [smem:[#allocation10_spill]] %s2769_s20 }
  0x17   :  { %s2789_s19 = sld [smem:[%s3190_s0 + %s2666_s15]]   ;;  %s2670_s15 = smov 23  }
  0x18   :  { %s2794_s20 = sld [smem:[%s3190_s0 + %s2667_s22]]   ;;  %s2671_s22 = smov 24  }
  0x1a   :  { %3197 = sst [smem:[#allocation11_spill]] %s2779_s4 }
  0x1b   :  { %3198 = sst [smem:[#allocation12_spill]] %s2784_s24 }
  0x1c   :  { %s2799_s4 = sld [smem:[%s3190_s0 + %s2668_s28]]   ;;  %s2672_s28 = smov 25  }
  0x1d   :  { %3199 = sst [smem:[#allocation13_spill]] %s2789_s19 }
  0x1e   :  { %3200 = sst [smem:[#allocation14_spill]] %s2794_s20 }
  0x1f   :  { %s2804_s24 = sld [smem:[%s3190_s0 + %s2669_s7]]   ;;  %s2673_s7 = smov 26  }
  0x20   :  { %s2809_s19 = sld [smem:[%s3190_s0 + %s2670_s15]]   ;;  %s2674_s15 = smov 27  }
  0x21   :  { %s2814_s20 = sld [smem:[%s3190_s0 + %s2671_s22]]   ;;  %s2675_s22 = smov 28  }
  0x22   :  { %3201 = sst [smem:[#allocation15_spill]] %s2799_s4 }
  0x23   :  { %s2819_s4 = sld [smem:[%s3190_s0 + %s2672_s28]]   ;;  %s2676_s28 = smov 29  }
  0x25   :  { %3202 = sst [smem:[#allocation16_spill]] %s2804_s24 }
  0x26   :  { %3203 = sst [smem:[#allocation17_spill]] %s2809_s19 }
  0x27   :  { %3204 = sst [smem:[#allocation18_spill]] %s2814_s20 }
  0x28   :  { %s2824_s24 = sld [smem:[%s3190_s0 + %s2673_s7]]  }
  0x29   :  { %3205 = sst [smem:[#allocation19_spill]] %s2819_s4 }
  0x2a   :  { %s2829_s19 = sld [smem:[%s3190_s0 + %s2674_s15]]  }
  0x2b   :  { %s2834_s20 = sld [smem:[%s3190_s0 + %s2675_s22]]  }
  0x2c   :  { %s2839_s4 = sld [smem:[%s3190_s0 + %s2676_s28]]  }
  0x2d   :  { %65 = vsyncpa [#allocation3], 0  ;;  %v125_v0 = vld [vmem:[%s2704_s13] sm:$0xff]  ;;  %vm133_vm0 = vcmask 64512   ;;  %v124_v2 = vld [vmem:[%s2694_s5 + $0x8] sm:$0xff] }
  0x2e   :  { %v123_v1 = vld [vmem:[%s2694_s5] sm:$0xff]  ;;  %2217 = vmatprep.subr.mxu0 %v125_v0  ;;  %v218_v4 = vld [vmem:[%s2714_s21 + $0x8] sm:$0xff] }
  0x2f   :  { %2219 = vmatprep.mubr.msk.f32.mxu0 %vm133_vm0, %v123_v1  ;;  %v217_v3 = vld [vmem:[%s2714_s21] sm:$0xff] }
  0x30   :  { %66 = vsyncpa [#allocation5], 0  ;;  %2218 = vmatpush3.msra.mxu0 %v125_v0  ;;  %v2314_v5 = vpack.c.bf16 %v218_v4, %v217_v3  ;;  %v219_v6 = vld [vmem:[%s2714_s21 + $0x10] sm:$0xff]  ;;  %v220_v7 = vld [vmem:[%s2714_s21 + $0x18] sm:$0xff]  ;;  %vm228_vm1 = vcmask 261120   ;;  %v2677_v22 = vmov 0.0|0.0  }
  0x31   :  { %2220 = vmatmul.mubr.msk.f32.vlgmr.msra.gmra.mrb[0].mxu0 %vm133_vm0, %v124_v2  ;;  %v2318_v8 = vpack.c.bf16 %v220_v7, %v219_v6  ;;  %v312_v9 = vld [vmem:[%s2724_s29] sm:$0xff]  ;;  %v313_v10 = vld [vmem:[%s2724_s29 + $0x8] sm:$0xff]  ;;  %v314_v19 = vld [vmem:[%s2724_s29 + $0x10] sm:$0xff]  ;;  %vm564_vm2 = vcmask 1045504   ;;  %vm2678_vm3 = vmmov 1   ;;  %vm2679_vm5 = vmmov 0  }
  0x32   :  { %2315 = vmatprep.subr.bf16.mxu0 %v2314_v5  ;;  %v2322_v11 = vpack.c.bf16 %v313_v10, %v312_v9  ;;  %v2122_v12 = vld [vmem:[%s2709_s17] ss:$0 sm:$0xff]  ;;  %v315_v20 = vld [vmem:[%s2724_s29 + $0x18] sm:$0xff]  ;;  %v407_v24 = vld [vmem:[%s2734_s8 + $0x8] sm:$0xff]  ;;  %v2680_v41 = vmov 0.0   ;;  %vm560_vm6 = vcmask 113664  }
  0x33   :  { %2317 = vmatpush3.bf16.msra.mxu0 %v2314_v5  ;;  %v2326_v21 = vpack.c.bf16 %v315_v20, %v314_v19  ;;  %v406_v23 = vld [vmem:[%s2734_s8] sm:$0xff]  ;;  %v552_v35 = vld [vmem:[%s2754_s30 + $0x8] sm:$0x3f]  ;;  %vm2340_vm4 = vmpackc.low %vm564_vm2, %vm2678_vm3  ;;  %s3206_s0 = sld [smem:[#allocation10_spill]]  ;;  %s3207_s5 = sld [smem:[#allocation12_spill]]  ;;  %vm498_vm7 = vcmask 130048  }
  0x34   :  { %2319 = vmatprep.subr.bf16.mxu0 %v2318_v8  ;;  %v2330_v25 = vpack.c.bf16 %v407_v24, %v406_v23  ;;  %v544_v26 = vld [vmem:[%s2699_s9] sm:$0x3]  ;;  %v640_v43 = vld [vmem:[%s2764_s12 + $0x8] sm:$0xff]  ;;  %v408_v45 = vld [vmem:[%s2734_s8 + $0x10] sm:$0xff]  ;;  %s3208_s9 = sld [smem:[#allocation11_spill]]  ;;  %s3209_s13 = sld [smem:[#allocation13_spill]] }
  0x35   :  { %v2136_v27 = vmul.f32 -1.442695, %v544_v26  ;;  %v2125_v30 = vld [vmem:[%s2719_s25] ss:$0 sm:$0xff]  ;;  %v409_v46 = vld [vmem:[%s2734_s8 + $0x18] sm:$0xff]  ;;  %v641_v48 = vld [vmem:[%s2764_s12 + $0x10] sm:$0xff] }
  0x36   :  { %2331 = vmatprep.subr.bf16.mxu1 %v2330_v25  ;;  %v551_v34 = vld [vmem:[%s2754_s30] sm:$0xff]  ;;  %v2334_v47 = vpack.c.bf16 %v409_v46, %v408_v45  ;;  %v642_v49 = vld [vmem:[%s2764_s12 + $0x18] sm:$0xff]  ;;  %v725_v0 = vld [vmem:[%s2774_s27 + $0x8] sm:$0xff]  ;;  %s3210_s17 = sld [smem:[#allocation16_spill]]  ;;  %vm893_vm8 = vcmask 517120   ;;  %s3212_s25 = sld [smem:[#allocation9_spill]] }
  0x37   :  { %2321 = vmatpush3.bf16.msra.mxu0 %v2318_v8  ;;  %2333 = vmatpush3.bf16.msra.mxu1 %v2330_v25  ;;  %2542 = vpow2.f32 %v2136_v27  ;;  %v2339_v38 = vpack.c.bf16 %v552_v35, %v551_v34  ;;  %v639_v42 = vld [vmem:[%s2764_s12] sm:$0xff]  ;;  %v2346_v50 = vpack.c.bf16 %v642_v49, %v641_v48  ;;  %v726_v2 = vld [vmem:[%s2774_s27 + $0x10] sm:$0xff]  ;;  %v727_v3 = vld [vmem:[%s2774_s27 + $0x18] sm:$0xff]  ;;  %s3211_s21 = sld [smem:[#allocation8_spill]]  ;;  %s3213_s29 = sld [smem:[#allocation18_spill]]  ;;  %vm1069_vm9 = vcmask 523264  }
  0x38   :  { %2323 = vmatprep.subr.bf16.mxu0 %v2322_v11  ;;  %v2343_v44 = vpack.c.bf16 %v640_v43, %v639_v42  ;;  %2335 = vmatprep.subr.bf16.mxu1 %v2334_v47  ;;  %v2128_v51 = vld [vmem:[%s2729_s3] ss:$0 sm:$0xff]  ;;  %v2352_v4 = vpack.c.bf16 %v727_v3, %v726_v2  ;;  %s3214_s3 = sld [smem:[#allocation14_spill]]  ;;  %s3215_s8 = sld [smem:[#allocation15_spill]]  ;;  %vm1184_vm12 = vcmask 254976   ;;  %vm1187_vm13 = vcmask 517376  }
  0x39   :  { %v2137_v56 = vld [vmem:[%s2759_s6] ss:$0 sm:$0xff]  ;;  %v811_v20 = vld [vmem:[%s3207_s5 + $0x10] sm:$0xff]  ;;  %s3216_s30 = sld [smem:[#allocation17_spill]]  ;;  %s3221_s6 = sld [smem:[#allocation19_spill]]  ;;  %vm1300_vm14 = vcmask 257026  }
  0x3a   :  { %v724_v63 = vld [vmem:[%s2774_s27] sm:$0xff]  ;;  %vm1303_vm15 = vcmask 519426   ;;  %vm1526_vm0 = vcmask 261126   ;;  %vm1413_vm2 = vcmask 259076   ;;  %vm1416_vm3 = vcmask 521476  }
  0x3b   :  { %2337 = vmatpush3.bf16.msra.mxu1 %v2334_v47  ;;  %v2349_v1 = vpack.c.bf16 %v725_v0, %v724_v63  ;;  %v2131_v5 = vld [vmem:[%s2739_s14] ss:$0 sm:$0xff]  ;;  %s2681_s14 = smov 64  }
  0x3c   :  { %2348 = vmatprep.subr.bf16.mxu1 %v2677_v22  ;;  %v2140_v7 = vld [vmem:[%s3206_s0] ss:$0 sm:$0xff]  ;;  %v925_v45 = vld [vmem:[%s3210_s17 + $0x8] sm:$0xff]  ;;  %v927_v46 = vld [vmem:[%s3210_s17 + $0x18] sm:$0xff] }
  0x3d   :  { %v2360_v47 = vpack.c.bf16 %v927_v46, %v925_v45  ;;  %v924_v48 = vld [vmem:[%s3210_s17] sm:$0xff]  ;;  %v926_v49 = vld [vmem:[%s3210_s17 + $0x10] sm:$0xff] }
  0x3e   :  { %v2134_v2 = vld [vmem:[%s3211_s21] ss:$0 sm:$0xff] }
  0x41   :  { %v2543_v28 = vpop.eup %2542 }
  0x42   :  { %v548_v29 = vadd.f32 1.0, %v2543_v28 }
  0x44   :  { %2544 = vrcp.f32 %v548_v29 }
  0x4e   :  { %v2545_v40 = vpop.eup %2544 }
 0x104   :  { %v2221_v13 = vpop.f32.mrb[0].mxu0 }
 0x105   :  { %v212_v14 = vadd.f32 %v2221_v13, %v2122_v12  ;;  %v206_v15 = vpop.f32.mrb[1].mxu0 }
 0x106   :  { %v207_v16 = vadd.f32 %v2122_v12, %v206_v15 }
 0x107   :  { %v216_v18 = vmax.f32 %v212_v14, 0.0 }
 0x108   :  { %v215_v17 = vmax.f32 %v207_v16, 0.0 }
 0x10a   :  { %2230 = vmatprep.mubr.msk.f32.mxu0 %vm228_vm1, %v215_v17  ;;  %v809_v17 = vld [vmem:[%s3207_s5] sm:$0xff] }
 0x10b   :  { %2231 = vmatmul.mubr.msk.f32.vlgmr.msra.gmra.mrb[2].mxu0 %vm228_vm1, %v216_v18  ;;  %v810_v18 = vld [vmem:[%s3207_s5 + $0x8] sm:$0xff] }
 0x10c   :  { %2325 = vmatpush3.bf16.msra.mxu0 %v2322_v11  ;;  %v2355_v19 = vpack.c.bf16 %v810_v18, %v809_v17  ;;  %v1029_v17 = vld [vmem:[%s3213_s29 + $0x30] sm:$0xff]  ;;  %v1032_v18 = vld [vmem:[%s3213_s29 + $0x48] sm:$0xff] }
 0x10d   :  { %2327 = vmatprep.subr.bf16.mxu0 %v2326_v21 }
 0x110   :  { %2329 = vmatpush3.bf16.msra.mxu0 %v2326_v21  ;;  %v812_v21 = vld [vmem:[%s3207_s5 + $0x18] sm:$0xff] }
 0x111   :  { %2338 = vmatprep.subr.bf16.mxu0 %v2677_v22  ;;  %v2358_v23 = vpack.c.bf16 %v812_v21, %v811_v20 }
 0x1de   :  { %v2232_v31 = vpop.f32.mrb[2].mxu0 }
 0x1df   :  { %v307_v32 = vadd.f32 %v2232_v31, %v2125_v30  ;;  %v301_v33 = vpop.f32.mrb[3].mxu0 }
 0x1e0   :  { %v302_v36 = vadd.f32 %v2125_v30, %v301_v33  ;;  %v2142_v30 = vld [vmem:[%s3208_s9] ss:$0 sm:$0xff] }
 0x1e1   :  { %v311_v39 = vmax.f32 %v307_v32, 0.0 }
 0x1e2   :  { %v310_v37 = vmax.f32 %v302_v36, 0.0  ;;  %v2144_v36 = vld [vmem:[%s3209_s13] ss:$0 sm:$0xff] }
 0x1e4   :  { %2241 = vmatprep.mubr.msk.f32.mxu0 %vm228_vm1, %v310_v37 }
 0x1e5   :  { %2242 = vmatmul.mubr.msk.f32.vlgmr.msra.gmra.mrb[4].mxu0 %vm228_vm1, %v311_v39 }
 0x1e6   :  { %2341 = vmatpush3.bf16.msk.msra.mxu0 %vm2340_vm4, %v2339_v38  ;;  %2259 = vmatprep.mubr.msk.f32.mxu0 %vm2679_vm5, %v2680_v41 }
 0x1e7   :  { %2342 = vmatprep.subr.bf16.mxu0 %v2677_v22 }
 0x1e9   :  { %2260 = vmatmul.mubr.msk.f32.vlgmr.msra.gmra.mrb[6].mxu0 %vm560_vm6, %v2545_v40 }
 0x1ea   :  { %2270 = vmatprep.mubr.msk.f32.mxu0 %vm2679_vm5, %v2680_v41  ;;  %2344 = vmatpush3.bf16.msra.mxu0 %v2343_v44 }
 0x1eb   :  { %2345 = vmatprep.subr.bf16.mxu0 %v2677_v22 }
 0x1ee   :  { %2347 = vmatpush3.bf16.msra.mxu0 %v2346_v50  ;;  %v2362_v50 = vpack.c.bf16 %v926_v49, %v924_v48 }
 0x1ef   :  { %2354 = vmatprep.subr.bf16.mxu0 %v2677_v22 }
 0x2b8   :  { %v2243_v52 = vpop.f32.mrb[4].mxu0 }
 0x2b9   :  { %v401_v53 = vadd.f32 %v2243_v52, %v2128_v51  ;;  %v395_v54 = vpop.f32.mrb[5].mxu0 }
 0x2ba   :  { %v396_v55 = vadd.f32 %v2128_v51, %v395_v54 }
 0x2bb   :  { %v405_v59 = vmax.f32 %v401_v53, 0.0 }
 0x2bc   :  { %v404_v57 = vmax.f32 %v396_v55, 0.0  ;;  %v634_v58 = vpop.f32.mrb[6].mxu0 }
 0x2bd   :  { %v635_v60 = vadd.f32 %v2137_v56, %v634_v58  ;;  %v2261_v61 = vpop.f32.mrb[7].mxu0 }
 0x2be   :  { %2252 = vmatprep.mubr.msk.f32.mxu1 %vm228_vm1, %v404_v57 }
 0x2bf   :  { %v638_v62 = vmax.f32 %v635_v60, 0.0  ;;  %2253 = vmatmul.mubr.msk.f32.vlgmr.msra.gmra.mrb[0].mxu1 %vm228_vm1, %v405_v59 }
 0x2c0   :  { %2281 = vmatprep.mubr.msk.f32.mxu1 %vm2679_vm5, %v2680_v41  ;;  %2350 = vmatpush3.bf16.msra.mxu1 %v2349_v1 }
 0x2c1   :  { %2271 = vmatmul.mubr.msk.f32.vlgmr.msra.gmra.mrb[8].mxu0 %vm228_vm1, %v638_v62  ;;  %2351 = vmatprep.subr.bf16.mxu1 %v2677_v22 }
 0x2c2   :  { %2292 = vmatprep.mubr.msk.f32.mxu0 %vm2679_vm5, %v2680_v41  ;;  %2356 = vmatpush3.bf16.msra.mxu0 %v2355_v19  ;;  %v1034_v19 = vld [vmem:[%s3213_s29 + $0x58] sm:$0xff] }
 0x2c3   :  { %2357 = vmatprep.subr.bf16.mxu0 %v2677_v22 }
 0x2c4   :  { %2353 = vmatpush3.bf16.msra.mxu1 %v2352_v4  ;;  %v2135_v4 = vld [vmem:[%s3212_s25] ss:$0 sm:$0xff] }
 0x2c5   :  { %2361 = vmatprep.subr.bf16.mxu1 %v2360_v47  ;;  %v928_v47 = vld [vmem:[%s3216_s30] sm:$0x3] }
 0x2c6   :  { %2359 = vmatpush3.bf16.msra.mxu0 %v2358_v23  ;;  %v2945_v23 = vpack.c.bf16 %v1034_v19, %v1032_v18 }
 0x392   :  { %v2254_v6 = vpop.f32.mrb[0].mxu1 }
 0x393   :  { %v489_v8 = vpop.f32.mrb[1].mxu1  ;;  %v495_v13 = vadd.f32 %v2254_v6, %v2131_v5 }
 0x394   :  { %v490_v9 = vadd.f32 %v2131_v5, %v489_v8  ;;  %v719_v10 = vpop.f32.mrb[8].mxu0  ;;  %v1026_v8 = vld [vmem:[%s3213_s29 + $0x18] sm:$0xff] }
 0x395   :  { %v720_v11 = vadd.f32 %v2140_v7, %v719_v10  ;;  %v2272_v12 = vpop.f32.mrb[9].mxu0  ;;  %v502_v16 = vsel %vm498_vm7, %v495_v13, 0.0  ;;  %v1024_v7 = vld [vmem:[%s3213_s29 + $0x8] sm:$0xff]  ;;  %v1023_v10 = vld [vmem:[%s3213_s29] sm:$0xff] }
 0x396   :  { %v499_v14 = vsel %vm498_vm7, %v490_v9, 0.0 }
 0x397   :  { %v723_v15 = vmax.f32 %v720_v11, 0.0  ;;  %500 = vadd.xlane.f32.xlu0 %v499_v14  ;;  %v1025_v11 = vld [vmem:[%s3213_s29 + $0x10] sm:$0xff]  ;;  %v1030_v14 = vld [vmem:[%s3213_s29 + $0x38] sm:$0xff] }
 0x398   :  { %v2928_v12 = vpack.c.bf16 %v1025_v11, %v1023_v10 }
 0x399   :  { %2282 = vmatmul.mubr.msk.f32.vlgmr.msra.gmra.mrb[2].mxu1 %vm228_vm1, %v723_v15  ;;  %v1027_v15 = vld [vmem:[%s3213_s29 + $0x20] sm:$0xff] }
 0x39a   :  { %1010 = vmatprep.mubr.f32.mxu1 %v2680_v41  ;;  %2363 = vmatpush1.bf16.msra.mxu1 %v2362_v50  ;;  %v2941_v21 = vpack.c.bf16 %v1029_v17, %v1027_v15 }
 0x39b   :  { %503 = vadd.xlane.f32.xlu0 %v502_v16 }
 0x424   :  { %v501_v24 = vpop.xlane.xlu0 %500 }
 0x425   :  { %v506_v35 = vmul.f32 0.0625, %v501_v24  ;;  %v1031_v24 = vld [vmem:[%s3213_s29 + $0x40] sm:$0xff] }
 0x427   :  { %v508_v37 = vsub.f32 %v490_v9, %v506_v35  ;;  %v2923_v9 = vpack.c.bf16 %v1026_v8, %v1024_v7 }
 0x428   :  { %v504_v25 = vpop.xlane.xlu0 %503 }
 0x429   :  { %v507_v26 = vmul.f32 0.0625, %v504_v25  ;;  %v510_v43 = vmul.f32 %v508_v37, %v508_v37  ;;  %2365 = vmatprep.subr.bf16.mxu1 %v2923_v9  ;;  %2381 = vmatprep.subr.bf16.mxu0 %v2923_v9  ;;  %v1033_v25 = vld [vmem:[%s3213_s29 + $0x50] sm:$0xff] }
 0x42b   :  { %v509_v27 = vsub.f32 %v495_v13, %v507_v26  ;;  %v512_v44 = vsel %vm498_vm7, %v510_v43, 0.0  ;;  %v1028_v13 = vld [vmem:[%s3213_s29 + $0x28] sm:$0xff]  ;;  %v930_v43 = vlaneseq }
 0x42c   :  { %v2935_v16 = vpack.c.bf16 %v1030_v14, %v1028_v13  ;;  %v1036_v26 = vld [vmem:[%s3213_s29 + $0x68] sm:$0xff] }
 0x42d   :  { %v511_v28 = vmul.f32 %v509_v27, %v509_v27  ;;  %v1041_v46 = vand.u32 127, %v930_v43 }
 0x42f   :  { %v515_v29 = vsel %vm498_vm7, %v511_v28, 0.0  ;;  %v2956_v28 = vpack.c.bf16 %v1033_v25, %v1031_v24  ;;  %v1042_v50 = vadd.s32 128, %v1041_v46 }
 0x430   :  { %516 = vadd.xlane.f32.xlu0 %v515_v29 }
 0x46c   :  { %v804_v31 = vpop.f32.mrb[2].mxu1 }
 0x46d   :  { %v805_v32 = vadd.f32 %v2142_v30, %v804_v31  ;;  %v2283_v33 = vpop.f32.mrb[3].mxu1  ;;  %v1035_v30 = vld [vmem:[%s3213_s29 + $0x60] sm:$0xff]  ;;  %v1037_v31 = vld [vmem:[%s3213_s29 + $0x70] sm:$0xff] }
 0x46f   :  { %v808_v34 = vmax.f32 %v805_v32, 0.0  ;;  %v2966_v32 = vpack.c.bf16 %v1037_v31, %v1035_v30  ;;  %v3032_v30 = vld [vmem:[%s3221_s6] ss:$0 sm:$0xff] }
 0x471   :  { %2293 = vmatmul.mubr.msk.f32.vlgmr.msra.gmra.mrb[10].mxu0 %vm228_vm1, %v808_v34  ;;  %vm1529_vm1 = vcmask 523526  }
 0x472   :  { %1255 = vmatprep.mubr.f32.mxu0 %v2680_v41  ;;  %2383 = vmatpush1.bf16.msra.mxu0 %v2928_v12 }
 0x473   :  { %2385 = vmatprep.subr.bf16.mxu0 %v2935_v16 }
 0x476   :  { %2387 = vmatpush1.bf16.msra.mxu0 %v2941_v21 }
 0x477   :  { %2389 = vmatprep.subr.bf16.mxu0 %v2945_v23 }
 0x47a   :  { %2391 = vmatpush1.bf16.msra.mxu0 %v2956_v28 }
 0x4bd   :  { %v517_v51 = vpop.xlane.xlu0 %516 }
 0x4be   :  { %v519_v52 = vmul.f32 0.0625, %v517_v51 }
 0x4c0   :  { %v521_v55 = vadd.f32 1e-05, %v519_v52 }
 0x4c2   :  { %2546 = vrsqrt.f32 %v521_v55 }
 0x4cc   :  { %v2547_v62 = vpop.eup %2546 }
 0x4cd   :  { %v525_v1 = vmul.f32 %v2547_v62, %v509_v27  ;;  %v1038_v27 = vld [vmem:[%s3213_s29 + $0x78] sm:$0xff] }
 0x4ce   :  { %v2959_v29 = vpack.c.bf16 %v1038_v27, %v1036_v26 }
 0x4cf   :  { %v534_v6 = vmul.f32 %v2134_v2, %v525_v1 }
 0x4d0   :  { %2393 = vmatprep.subr.bf16.mxu0 %v2959_v29 }
 0x4d1   :  { %v543_v20 = vadd.f32 %v2135_v4, %v534_v6  ;;  %2395 = vmatpush1.bf16.msra.mxu0 %v2966_v32 }
 0x4d2   :  { %2413 = vmatprep.subr.bf16.mxu0 %v2923_v9 }
 0x544   :  { %v889_v38 = vpop.f32.mrb[10].mxu0 }
 0x545   :  { %v890_v39 = vadd.f32 %v2144_v36, %v889_v38  ;;  %v2294_v40 = vpop.f32.mrb[11].mxu0 }
 0x547   :  { %v894_v42 = vsel %vm893_vm8, %v890_v39, 0.0 }
 0x548   :  { %895 = vadd.xlane.f32.xlu1 %v894_v42 }
 0x54c   :  { %513 = vadd.xlane.f32.xlu1 %v512_v44  ;;  %v931_v44 = vshrl.u32 %v930_v43, 7 }
 0x54e   :  { %v932_v45 = vsub.s32 0, %v931_v44  ;;  %v936_v48 = vsub.s32 1, %v931_v44 }
 0x550   :  { %v933_v49 = vrot.slane %v928_v47, %v932_v45  ;;  %v937_v51 = vrot.slane %v928_v47, %v936_v48 }
 0x5d5   :  { %v896_v53 = vpop.xlane.xlu1 %895 }
 0x5d6   :  { %v898_v54 = vmul.f32 0.015625, %v896_v53  ;;  %v1047_v53 = vand.u32 63, %v1041_v46 }
 0x5d8   :  { %v2914_v56 = vsub.f32 %v890_v39, %v898_v54  ;;  %v2147_v39 = vld [vmem:[%s3215_s8] ss:$0 sm:$0xff]  ;;  %vm2990_vm10 = vcmp.lt.s32.totalorder %v1047_v53, 32 }
 0x5d9   :  { %v514_v57 = vpop.xlane.xlu1 %513 }
 0x5da   :  { %v518_v58 = vmul.f32 0.0625, %v514_v57  ;;  %v900_v59 = vmul.f32 %v2914_v56, %v2914_v56 }
 0x5dc   :  { %v520_v60 = vadd.f32 1e-05, %v518_v58  ;;  %v901_v61 = vsel %vm893_vm8, %v900_v59, 0.0 }
 0x5dd   :  { %902 = vadd.xlane.f32.xlu1 %v901_v61 }
 0x5de   :  { %2548 = vrsqrt.f32 %v520_v60 }
 0x5e8   :  { %v2549_v63 = vpop.eup %2548 }
 0x5e9   :  { %v524_v0 = vmul.f32 %v2549_v63, %v508_v37  ;;  %v2146_v37 = vld [vmem:[%s3214_s3] ss:$0 sm:$0xff] }
 0x5eb   :  { %v533_v3 = vmul.f32 %v2134_v2, %v524_v0 }
 0x5ed   :  { %v542_v5 = vadd.f32 %v2135_v4, %v533_v3 }
 0x5ef   :  { %2148 = vmatmul.mubr.msk.f32.vlgmr.msra.gmra.mrb[4].mxu1 %vm498_vm7, %v542_v5 }
 0x5f0   :  { %1016 = vmatprep.mubr.f32.mxu1 %v2680_v41  ;;  %2367 = vmatpush1.bf16.msra.mxu1 %v2928_v12 }
 0x5f1   :  { %2369 = vmatprep.subr.bf16.mxu1 %v2935_v16 }
 0x5f3   :  { %2149 = vmatmul.mubr.msk.f32.gmra.mrb[6].mxu1 %vm498_vm7, %v543_v20 }
 0x5f4   :  { %1137 = vmatprep.mubr.f32.mxu1 %v2680_v41  ;;  %2371 = vmatpush1.bf16.msra.mxu1 %v2941_v21 }
 0x5f5   :  { %2373 = vmatprep.subr.bf16.mxu1 %v2945_v23 }
 0x5f8   :  { %2375 = vmatpush1.bf16.msra.mxu1 %v2956_v28 }
 0x5f9   :  { %2377 = vmatprep.subr.bf16.mxu1 %v2959_v29 }
 0x5fc   :  { %2379 = vmatpush1.bf16.msra.mxu1 %v2966_v32 }
 0x5fd   :  { %2397 = vmatprep.subr.bf16.mxu1 %v2923_v9 }
 0x66a   :  { %v903_v33 = vpop.xlane.xlu1 %902 }
 0x66b   :  { %v904_v34 = vmul.f32 0.015625, %v903_v33 }
 0x66d   :  { %v905_v35 = vadd.f32 1e-05, %v904_v34 }
 0x66f   :  { %2550 = vrsqrt.f32 %v905_v35 }
 0x679   :  { %v2551_v36 = vpop.eup %2550 }
 0x67a   :  { %v907_v38 = vmul.f32 %v2551_v36, %v2914_v56  ;;  %v1054_v56 = vand.u32 63, %v1042_v50 }
 0x67c   :  { %v915_v40 = vmul.f32 %v2146_v37, %v907_v38  ;;  %vm2994_vm11 = vcmp.lt.s32.totalorder %v1054_v56, 32 }
 0x67e   :  { %v923_v42 = vadd.f32 %v2147_v39, %v915_v40 }
 0x680   :  { %1175 = vrot.lane.b32.xlu1 %v923_v42, %s2681_s14  ;;  %2150 = vmatmul.mubr.msk.f32.vlgmr.msra.gmra.mrb[8].mxu1 %vm1069_vm9, %v923_v42 }
 0x681   :  { %2399 = vmatpush1.bf16.msra.mxu1 %v2928_v12  ;;  %1374 = vmatprep.mubr.f32.mxu1 %v2680_v41 }
 0x682   :  { %2401 = vmatprep.subr.bf16.mxu1 %v2935_v16 }
 0x685   :  { %2403 = vmatpush1.bf16.msra.mxu1 %v2941_v21 }
 0x686   :  { %2405 = vmatprep.subr.bf16.mxu1 %v2945_v23 }
 0x689   :  { %2407 = vmatpush1.bf16.msra.mxu1 %v2956_v28 }
 0x68a   :  { %2409 = vmatprep.subr.bf16.mxu1 %v2959_v29 }
 0x68d   :  { %2411 = vmatpush1.bf16.msra.mxu1 %v2966_v32 }
 0x68e   :  { %2429 = vmatprep.subr.bf16.mxu1 %v2923_v9 }
 0x6c2   :  { %v1012_v52 = vpop.f32.mrb[4].mxu1 }
 0x6c3   :  { %v1013_v54 = vadd.f32 %v1012_v52, %v933_v49  ;;  %v1014_v55 = vpop.f32.mrb[5].mxu1 }
 0x6c4   :  { %v1015_v57 = vadd.f32 %v1014_v55, %v937_v51 }
 0x6c5   :  { %v1609_v63 = vrot.slane %v1013_v54, 6  ;;  %v1714_v0 = vrot.slane %v1013_v54, 2 }
 0x6c6   :  { %v1018_v58 = vpop.f32.mrb[6].mxu1  ;;  %v1610_v1 = vrot.slane %v1015_v57, 6  ;;  %v1715_v2 = vrot.slane %v1015_v57, 2 }
 0x6c7   :  { %v1019_v60 = vadd.f32 %v1018_v58, %v933_v49  ;;  %v1020_v61 = vpop.f32.mrb[7].mxu1 }
 0x6c8   :  { %v1021_v3 = vadd.f32 %v1020_v61, %v937_v51 }
 0x6c9   :  { %v1146_v4 = vrot.slane %v1019_v60, 6  ;;  %v1262_v5 = vrot.slane %v1019_v60, 2  ;;  %v3000_v6 = vsel %vm2990_vm10, %v1019_v60, %v1609_v63  ;;  %v3004_v7 = vsel %vm2990_vm10, %v1019_v60, %v1714_v0 }
 0x6ca   :  { %v1147_v8 = vrot.slane %v1021_v3, 6  ;;  %v1263_v10 = vrot.slane %v1021_v3, 2  ;;  %v3008_v11 = vsel %vm2994_vm11, %v1021_v3, %v1610_v1  ;;  %v3012_v13 = vsel %vm2994_vm11, %v1021_v3, %v1715_v2 }
 0x6cb   :  { %v3016_v14 = vsel %vm2990_vm10, %v1013_v54, %v1146_v4  ;;  %v3020_v15 = vsel %vm2990_vm10, %v1013_v54, %v1262_v5 }
 0x6cc   :  { %v3024_v17 = vsel %vm2994_vm11, %v1015_v57, %v1147_v8  ;;  %v3028_v18 = vsel %vm2994_vm11, %v1015_v57, %v1263_v10 }
 0x6f2   :  { %v1176_v38 = vpop.permute.xlu1 %1175 }
 0x753   :  { %v1139_v19 = vpop.f32.mrb[8].mxu1 }
 0x754   :  { %v1152_v20 = vadd.f32 %v3016_v14, %v1139_v19  ;;  %v1141_v24 = vpop.f32.mrb[9].mxu1 }
 0x755   :  { %v1165_v31 = vadd.f32 %v3032_v30, %v1141_v24 }
 0x756   :  { %v2151_v25 = vmul.f32 -1.442695, %v1152_v20 }
 0x758   :  { %2552 = vpow2.f32 %v2151_v25 }
 0x762   :  { %v2553_v26 = vpop.eup %2552 }
 0x763   :  { %v1156_v27 = vadd.f32 1.0, %v2553_v26 }
 0x765   :  { %2554 = vrcp.f32 %v1156_v27 }
 0x76f   :  { %v2555_v33 = vpop.eup %2554 }
 0x770   :  { %v1166_v34 = vmul.f32 %v2555_v33, %v1165_v31  ;;  %v1169_v37 = vsub.f32 1.0, %v2555_v33  ;;  %v1178_v40 = vmul.f32 %v2555_v33, %v1176_v38 }
 0x772   :  { %v1167_v35 = vadd.f32 %v1166_v34, %v3024_v17 }
 0x774   :  { %2556 = vtanh.f32 %v1167_v35 }
 0x77e   :  { %v2557_v36 = vpop.eup %2556 }
 0x77f   :  { %1171 = vrot.lane.b32.xlu0 %v2557_v36, %s2681_s14 }
 0x7f1   :  { %v1172_v39 = vpop.permute.xlu0 %1171 }
 0x7f2   :  { %v1174_v42 = vmul.f32 %v1172_v39, %v1169_v37 }
 0x7f4   :  { %v1179_v43 = vadd.f32 %v1178_v40, %v1174_v42 }
 0x7f6   :  { %1181 = vrot.lane.b32.xlu1 %v1179_v43, %s2681_s14  ;;  %v1291_v53 = vrot.slane %v1179_v43, 6 }
 0x868   :  { %v1182_v44 = vpop.permute.xlu1 %1181 }
 0x869   :  { %1185 = vst.msk [vmem:[#allocation2] sm:$0x3] %vm1184_vm12, %v1182_v44  ;;  %2153 = vmatmul.mubr.msk.f32.vlgmr.msra.gmra.mrb[12].mxu0 %vm1069_vm9, %v1182_v44 }
 0x86a   :  { %1188 = vst.msk [vmem:[#allocation2 + $0xe] sm:$0x3] %vm1187_vm13, %v1182_v44  ;;  %2415 = vmatpush1.bf16.msra.mxu0 %v2928_v12  ;;  %1487 = vmatprep.mubr.f32.mxu0 %v2680_v41 }
 0x86b   :  { %2417 = vmatprep.subr.bf16.mxu0 %v2935_v16 }
 0x86e   :  { %2419 = vmatpush1.bf16.msra.mxu0 %v2941_v21 }
 0x86f   :  { %2421 = vmatprep.subr.bf16.mxu0 %v2945_v23 }
 0x872   :  { %2423 = vmatpush1.bf16.msra.mxu0 %v2956_v28 }
 0x873   :  { %2425 = vmatprep.subr.bf16.mxu0 %v2959_v29 }
 0x876   :  { %2427 = vmatpush1.bf16.msra.mxu0 %v2966_v32 }
 0x877   :  { %2445 = vmatprep.subr.bf16.mxu0 %v2923_v9 }
 0x93c   :  { %v1257_v45 = vpop.f32.mrb[12].mxu0 }
 0x93d   :  { %v1269_v46 = vrot.slane %v1257_v45, 6  ;;  %v1259_v47 = vpop.f32.mrb[13].mxu0 }
 0x93e   :  { %v1278_v52 = vadd.f32 %v3032_v30, %v1259_v47 }
 0x93f   :  { %v1271_v48 = vadd.f32 %v1269_v46, %v3020_v15 }
 0x940   :  { %v1280_v54 = vrot.slane %v1278_v52, 6 }
 0x941   :  { %v2154_v49 = vmul.f32 -1.442695, %v1271_v48 }
 0x943   :  { %2558 = vpow2.f32 %v2154_v49 }
 0x94d   :  { %v2559_v50 = vpop.eup %2558 }
 0x94e   :  { %v1275_v51 = vadd.f32 1.0, %v2559_v50 }
 0x950   :  { %2560 = vrcp.f32 %v1275_v51 }
 0x95a   :  { %v2561_v55 = vpop.eup %2560 }
 0x95b   :  { %v1282_v56 = vmul.f32 %v2561_v55, %v1280_v54  ;;  %v1293_v57 = vmul.f32 %v2561_v55, %v1291_v53  ;;  %v1285_v60 = vsub.f32 1.0, %v2561_v55 }
 0x95d   :  { %v1283_v58 = vadd.f32 %v1282_v56, %v3028_v18 }
 0x95f   :  { %2562 = vtanh.f32 %v1283_v58 }
 0x969   :  { %v2563_v59 = vpop.eup %2562 }
 0x96a   :  { %1287 = vrot.lane.b32.xlu1 %v2563_v59, %s2681_s14 }
 0x9dc   :  { %v1288_v61 = vpop.permute.xlu1 %1287 }
 0x9dd   :  { %v1290_v62 = vmul.f32 %v1288_v61, %v1285_v60 }
 0x9df   :  { %v3054_v63 = vadd.f32 %v1293_v57, %v1290_v62 }
 0x9e1   :  { %v1305_v0 = vrot.slane %v3054_v63, 2  ;;  %v1404_v34 = vrot.slane %v3054_v63, 6 }
 0x9e3   :  { %1306 = vrot.lane.b32.xlu0 %v1305_v0, %s2681_s14 }
 0xa55   :  { %v1307_v1 = vpop.permute.xlu0 %1306 }
 0xa56   :  { %2155 = vmatmul.mubr.msk.f32.vlgmr.msra.gmra.mrb[10].mxu1 %vm1069_vm9, %v1307_v1 }
 0xa57   :  { %2431 = vmatpush1.bf16.msra.mxu1 %v2928_v12  ;;  %1600 = vmatprep.mubr.f32.mxu1 %v2680_v41 }
 0xa58   :  { %2433 = vmatprep.subr.bf16.mxu1 %v2935_v16 }
 0xa5b   :  { %2435 = vmatpush1.bf16.msra.mxu1 %v2941_v21 }
 0xa5c   :  { %2437 = vmatprep.subr.bf16.mxu1 %v2945_v23 }
 0xa5f   :  { %2439 = vmatpush1.bf16.msra.mxu1 %v2956_v28 }
 0xa60   :  { %2441 = vmatprep.subr.bf16.mxu1 %v2959_v29 }
 0xa63   :  { %2443 = vmatpush1.bf16.msra.mxu1 %v2966_v32 }
 0xa64   :  { %2461 = vmatprep.subr.bf16.mxu1 %v2923_v9 }
 0xb29   :  { %v1376_v2 = vpop.f32.mrb[10].mxu1 }
 0xb2a   :  { %v1382_v3 = vrot.slane %v1376_v2, 4  ;;  %v1378_v4 = vpop.f32.mrb[11].mxu1 }
 0xb2b   :  { %v1391_v20 = vadd.f32 %v3032_v30, %v1378_v4 }
 0xb2c   :  { %v1384_v5 = vadd.f32 %v1382_v3, %v3016_v14 }
 0xb2d   :  { %v1393_v24 = vrot.slane %v1391_v20, 4 }
 0xb2e   :  { %v2156_v8 = vmul.f32 -1.442695, %v1384_v5 }
 0xb30   :  { %2564 = vpow2.f32 %v2156_v8 }
 0xb3a   :  { %v2565_v10 = vpop.eup %2564 }
 0xb3b   :  { %v1388_v19 = vadd.f32 1.0, %v2565_v10 }
 0xb3d   :  { %2566 = vrcp.f32 %v1388_v19 }
 0xb47   :  { %v2567_v25 = vpop.eup %2566 }
 0xb48   :  { %v1395_v26 = vmul.f32 %v2567_v25, %v1393_v24  ;;  %v1398_v33 = vsub.f32 1.0, %v2567_v25  ;;  %v1406_v35 = vmul.f32 %v2567_v25, %v1404_v34 }
 0xb4a   :  { %v1396_v27 = vadd.f32 %v1395_v26, %v3024_v17 }
 0xb4c   :  { %2568 = vtanh.f32 %v1396_v27 }
 0xb56   :  { %v2569_v31 = vpop.eup %2568 }
 0xb57   :  { %1400 = vrot.lane.b32.xlu1 %v2569_v31, %s2681_s14 }
 0xbc9   :  { %v1401_v14 = vpop.permute.xlu1 %1400 }
 0xbca   :  { %v1403_v36 = vmul.f32 %v1401_v14, %v1398_v33 }
 0xbcc   :  { %v3073_v37 = vadd.f32 %v1406_v35, %v1403_v36 }
 0xbce   :  { %v1418_v38 = vrot.slane %v3073_v37, 4  ;;  %v1517_v53 = vrot.slane %v3073_v37, 6 }
 0xbd0   :  { %1419 = vrot.lane.b32.xlu0 %v1418_v38, %s2681_s14 }
 0xc42   :  { %v1420_v39 = vpop.permute.xlu0 %1419 }
 0xc43   :  { %2157 = vmatmul.mubr.msk.f32.vlgmr.msra.gmra.mrb[14].mxu0 %vm1069_vm9, %v1420_v39 }
 0xc44   :  { %2447 = vmatpush1.bf16.msra.mxu0 %v2928_v12  ;;  %1707 = vmatprep.mubr.f32.mxu0 %v2680_v41 }
 0xc45   :  { %2449 = vmatprep.subr.bf16.mxu0 %v2935_v16 }
 0xc48   :  { %2451 = vmatpush1.bf16.msra.mxu0 %v2941_v21 }
 0xc49   :  { %2453 = vmatprep.subr.bf16.mxu0 %v2945_v23 }
 0xc4c   :  { %2455 = vmatpush1.bf16.msra.mxu0 %v2956_v28 }
 0xc4d   :  { %2457 = vmatprep.subr.bf16.mxu0 %v2959_v29 }
 0xc50   :  { %2459 = vmatpush1.bf16.msra.mxu0 %v2966_v32 }
 0xc51   :  { %2477 = vmatprep.subr.bf16.mxu0 %v2923_v9 }
 0xd16   :  { %v1489_v17 = vpop.f32.mrb[14].mxu0 }
 0xd17   :  { %v1495_v40 = vrot.slane %v1489_v17, 2  ;;  %v1491_v42 = vpop.f32.mrb[15].mxu0 }
 0xd18   :  { %v1504_v47 = vadd.f32 %v3032_v30, %v1491_v42 }
 0xd19   :  { %v1497_v43 = vadd.f32 %v1495_v40, %v3020_v15 }
 0xd1a   :  { %v1506_v48 = vrot.slane %v1504_v47, 2 }
 0xd1b   :  { %v2158_v44 = vmul.f32 -1.442695, %v1497_v43 }
 0xd1d   :  { %2570 = vpow2.f32 %v2158_v44 }
 0xd27   :  { %v2571_v45 = vpop.eup %2570 }
 0xd28   :  { %v1501_v46 = vadd.f32 1.0, %v2571_v45 }
 0xd2a   :  { %2572 = vrcp.f32 %v1501_v46 }
 0xd34   :  { %v2573_v49 = vpop.eup %2572 }
 0xd35   :  { %v1508_v50 = vmul.f32 %v2573_v49, %v1506_v48  ;;  %v1511_v9 = vsub.f32 1.0, %v2573_v49  ;;  %v1519_v54 = vmul.f32 %v2573_v49, %v1517_v53 }
 0xd37   :  { %v1509_v51 = vadd.f32 %v1508_v50, %v3028_v18 }
 0xd39   :  { %2574 = vtanh.f32 %v1509_v51 }
 0xd43   :  { %v2575_v52 = vpop.eup %2574 }
 0xd44   :  { %1513 = vrot.lane.b32.xlu1 %v2575_v52, %s2681_s14 }
 0xdb6   :  { %v1514_v15 = vpop.permute.xlu1 %1513 }
 0xdb7   :  { %v1516_v55 = vmul.f32 %v1514_v15, %v1511_v9 }
 0xdb9   :  { %v3092_v56 = vadd.f32 %v1519_v54, %v1516_v55 }
 0xdbb   :  { %v1531_v57 = vrot.slane %v3092_v56, 6 }
 0xdbd   :  { %1532 = vrot.lane.b32.xlu0 %v1531_v57, %s2681_s14 }
 0xe2f   :  { %v1533_v58 = vpop.permute.xlu0 %1532 }
 0xe30   :  { %2159 = vmatmul.mubr.msk.f32.vlgmr.msra.gmra.mrb[12].mxu1 %vm1069_vm9, %v1533_v58 }
 0xe31   :  { %2463 = vmatpush1.bf16.msra.mxu1 %v2928_v12  ;;  %1822 = vmatprep.mubr.f32.mxu1 %v2680_v41 }
 0xe32   :  { %2465 = vmatprep.subr.bf16.mxu1 %v2935_v16 }
 0xe35   :  { %2467 = vmatpush1.bf16.msra.mxu1 %v2941_v21 }
 0xe36   :  { %2469 = vmatprep.subr.bf16.mxu1 %v2945_v23 }
 0xe39   :  { %2471 = vmatpush1.bf16.msra.mxu1 %v2956_v28 }
 0xe3a   :  { %2473 = vmatprep.subr.bf16.mxu1 %v2959_v29 }
 0xe3d   :  { %2475 = vmatpush1.bf16.msra.mxu1 %v2966_v32 }
 0xe3e   :  { %2492 = vmatprep.subr.bf16.mxu1 %v2677_v22 }
 0xf03   :  { %v1602_v18 = vpop.f32.mrb[12].mxu1 }
 0xf04   :  { %v1615_v59 = vadd.f32 %v3000_v6, %v1602_v18  ;;  %v1604_v60 = vpop.f32.mrb[13].mxu1 }
 0xf05   :  { %v1622_v1 = vadd.f32 %v3032_v30, %v1604_v60 }
 0xf06   :  { %v2160_v61 = vmul.f32 -1.442695, %v1615_v59 }
 0xf08   :  { %2576 = vpow2.f32 %v2160_v61 }
 0xf12   :  { %v2577_v62 = vpop.eup %2576 }
 0xf13   :  { %v1619_v0 = vadd.f32 1.0, %v2577_v62 }
 0xf15   :  { %2578 = vrcp.f32 %v1619_v0 }
 0xf1f   :  { %v2579_v2 = vpop.eup %2578 }
 0xf20   :  { %v1623_v3 = vmul.f32 %v2579_v2, %v1622_v1  ;;  %v1626_v8 = vsub.f32 1.0, %v2579_v2  ;;  %v1633_v19 = vmul.f32 %v2579_v2, %v1531_v57 }
 0xf22   :  { %v1624_v4 = vadd.f32 %v1623_v3, %v3008_v11 }
 0xf24   :  { %2580 = vtanh.f32 %v1624_v4 }
 0xf2e   :  { %v2581_v5 = vpop.eup %2580 }
 0xf2f   :  { %1628 = vrot.lane.b32.xlu1 %v2581_v5, %s2681_s14 }
 0xfa1   :  { %v1629_v10 = vpop.permute.xlu1 %1628 }
 0xfa2   :  { %v1631_v20 = vmul.f32 %v1629_v10, %v1626_v8 }
 0xfa4   :  { %v1634_v24 = vadd.f32 %v1633_v19, %v1631_v20 }
 0xfa6   :  { %1636 = vrot.lane.b32.xlu0 %v1634_v24, %s2681_s14 }
0x1018   :  { %v3111_v25 = vpop.permute.xlu0 %1636 }
0x1019   :  { %2161 = vmatmul.mubr.msk.f32.vlgmr.msra.gmra.mrb[16].mxu0 %vm1069_vm9, %v3111_v25 }
0x101a   :  { %2479 = vmatpush1.bf16.msra.mxu0 %v2928_v12  ;;  %1931 = vmatprep.mubr.f32.mxu0 %v2680_v41 }
0x101b   :  { %2481 = vmatprep.subr.bf16.mxu0 %v2935_v16 }
0x101e   :  { %2483 = vmatpush1.bf16.msra.mxu0 %v2941_v21  ;;  %v1743_v21 = vrot.slane %v1634_v24, 6  ;;  %v1972_v24 = vld [vmem:[%s2824_s24 + $0x8] sm:$0xff] }
0x101f   :  { %2485 = vmatprep.subr.bf16.mxu0 %v2945_v23 }
0x1022   :  { %2487 = vmatpush1.bf16.msra.mxu0 %v2956_v28 }
0x1023   :  { %2489 = vmatprep.subr.bf16.mxu0 %v2959_v29 }
0x1026   :  { %2491 = vmatpush1.bf16.msra.mxu0 %v2966_v32 }
0x10ec   :  { %v1709_v26 = vpop.f32.mrb[16].mxu0 }
0x10ed   :  { %v1721_v27 = vrot.slane %v1709_v26, 6  ;;  %v1711_v31 = vpop.f32.mrb[17].mxu0  ;;  %v1973_v26 = vld [vmem:[%s2824_s24 + $0x10] sm:$0xff] }
0x10ee   :  { %v1730_v16 = vadd.f32 %v3032_v30, %v1711_v31 }
0x10ef   :  { %v1723_v33 = vadd.f32 %v1721_v27, %v3004_v7  ;;  %v1974_v27 = vld [vmem:[%s2824_s24 + $0x18] sm:$0xff] }
0x10f0   :  { %v1732_v23 = vrot.slane %v1730_v16, 6  ;;  %v2496_v31 = vpack.c.bf16 %v1974_v27, %v1973_v26 }
0x10f1   :  { %v2162_v12 = vmul.f32 -1.442695, %v1723_v33  ;;  %v1976_v33 = vld [vmem:[%s2824_s24 + $0x28] sm:$0xff] }
0x10f3   :  { %2582 = vpow2.f32 %v2162_v12  ;;  %v1977_v12 = vld [vmem:[%s2824_s24 + $0x30] sm:$0xff] }
0x10fd   :  { %v2583_v34 = vpop.eup %2582 }
0x10fe   :  { %v1727_v14 = vadd.f32 1.0, %v2583_v34  ;;  %v1978_v34 = vld [vmem:[%s2824_s24 + $0x38] sm:$0xff] }
0x1100   :  { %2584 = vrcp.f32 %v1727_v14  ;;  %v2502_v14 = vpack.c.bf16 %v1978_v34, %v1977_v12 }
0x110a   :  { %v2585_v35 = vpop.eup %2584 }
0x110b   :  { %v1734_v28 = vmul.f32 %v2585_v35, %v1732_v23  ;;  %v1745_v36 = vmul.f32 %v2585_v35, %v1743_v21  ;;  %v1737_v38 = vsub.f32 1.0, %v2585_v35 }
0x110d   :  { %v1735_v29 = vadd.f32 %v1734_v28, %v3012_v13 }
0x110f   :  { %2586 = vtanh.f32 %v1735_v29 }
0x1119   :  { %v2587_v32 = vpop.eup %2586 }
0x111a   :  { %1739 = vrot.lane.b32.xlu1 %v2587_v32, %s2681_s14 }
0x118c   :  { %v1740_v39 = vpop.permute.xlu1 %1739 }
0x118d   :  { %v1742_v17 = vmul.f32 %v1740_v39, %v1737_v38 }
0x118f   :  { %v3127_v40 = vadd.f32 %v1745_v36, %v1742_v17 }
0x1191   :  { %v1753_v42 = vrot.slane %v3127_v40, 2  ;;  %v1852_v55 = vrot.slane %v3127_v40, 6 }
0x1193   :  { %1754 = vrot.lane.b32.xlu0 %v1753_v42, %s2681_s14 }
0x1205   :  { %v1755_v43 = vpop.permute.xlu0 %1754 }
0x1206   :  { %2163 = vmatmul.mubr.msk.f32.vlgmr.msra.gmra.mrb[14].mxu1 %vm1069_vm9, %v1755_v43 }
0x1207   :  { %2311 = vmatprep.mubr.msk.f32.mxu1 %vm2679_vm5, %v2680_v41 }
0x12d9   :  { %v1824_v44 = vpop.f32.mrb[14].mxu1 }
0x12da   :  { %v1830_v45 = vrot.slane %v1824_v44, 4  ;;  %v1826_v46 = vpop.f32.mrb[15].mxu1 }
0x12db   :  { %v1839_v51 = vadd.f32 %v3032_v30, %v1826_v46 }
0x12dc   :  { %v1832_v47 = vadd.f32 %v1830_v45, %v3000_v6 }
0x12dd   :  { %v1841_v52 = vrot.slane %v1839_v51, 4 }
0x12de   :  { %v2164_v48 = vmul.f32 -1.442695, %v1832_v47 }
0x12e0   :  { %2588 = vpow2.f32 %v2164_v48 }
0x12ea   :  { %v2589_v49 = vpop.eup %2588 }
0x12eb   :  { %v1836_v50 = vadd.f32 1.0, %v2589_v49 }
0x12ed   :  { %2590 = vrcp.f32 %v1836_v50 }
0x12f7   :  { %v2591_v9 = vpop.eup %2590 }
0x12f8   :  { %v1843_v53 = vmul.f32 %v2591_v9, %v1841_v52  ;;  %v1846_v41 = vsub.f32 1.0, %v2591_v9  ;;  %v1854_v57 = vmul.f32 %v2591_v9, %v1852_v55 }
0x12fa   :  { %v1844_v15 = vadd.f32 %v1843_v53, %v3008_v11 }
0x12fc   :  { %2592 = vtanh.f32 %v1844_v15 }
0x1306   :  { %v2593_v54 = vpop.eup %2592 }
0x1307   :  { %1848 = vrot.lane.b32.xlu1 %v2593_v54, %s2681_s14 }
0x1379   :  { %v1849_v6 = vpop.permute.xlu1 %1848 }
0x137a   :  { %v1851_v58 = vmul.f32 %v1849_v6, %v1846_v41 }
0x137c   :  { %v1855_v18 = vadd.f32 %v1854_v57, %v1851_v58 }
0x137e   :  { %v1862_v59 = vrot.slane %v1855_v18, 4  ;;  %v1961_v16 = vrot.slane %v1855_v18, 6 }
0x1380   :  { %1863 = vrot.lane.b32.xlu0 %v1862_v59, %s2681_s14 }
0x13f2   :  { %v1864_v60 = vpop.permute.xlu0 %1863 }
0x13f3   :  { %2165 = vmatmul.mubr.msk.f32.vlgmr.msra.gmra.mrb[18].mxu0 %vm1069_vm9, %v1864_v60 }
0x14c6   :  { %v1933_v61 = vpop.f32.mrb[18].mxu0 }
0x14c7   :  { %v1939_v62 = vrot.slane %v1933_v61, 2  ;;  %v1935_v11 = vpop.f32.mrb[19].mxu0 }
0x14c8   :  { %v1948_v4 = vadd.f32 %v3032_v30, %v1935_v11 }
0x14c9   :  { %v1941_v0 = vadd.f32 %v1939_v62, %v3004_v7  ;;  %v1971_v7 = vld [vmem:[%s2824_s24] sm:$0xff] }
0x14ca   :  { %v1950_v5 = vrot.slane %v1948_v4, 2  ;;  %v2493_v30 = vpack.c.bf16 %v1972_v24, %v1971_v7 }
0x14cb   :  { %v2166_v1 = vmul.f32 -1.442695, %v1941_v0 }
0x14cc   :  { %2494 = vmatpush3.bf16.msra.mxu1 %v2493_v30 }
0x14cd   :  { %2594 = vpow2.f32 %v2166_v1  ;;  %2495 = vmatprep.subr.bf16.mxu1 %v2677_v22 }
0x14d0   :  { %2497 = vmatpush3.bf16.msra.mxu1 %v2496_v31 }
0x14d1   :  { %2498 = vmatprep.subr.bf16.mxu1 %v2677_v22 }
0x14d7   :  { %v2595_v2 = vpop.eup %2594 }
0x14d8   :  { %v1945_v3 = vadd.f32 1.0, %v2595_v2 }
0x14da   :  { %2596 = vrcp.f32 %v1945_v3 }
0x14e4   :  { %v2597_v8 = vpop.eup %2596 }
0x14e5   :  { %v1952_v10 = vmul.f32 %v2597_v8, %v1950_v5  ;;  %v1963_v23 = vmul.f32 %v2597_v8, %v1961_v16 }
0x14e7   :  { %v1953_v19 = vadd.f32 %v1952_v10, %v3012_v13  ;;  %v1975_v13 = vld [vmem:[%s2824_s24 + $0x20] sm:$0xff]  ;;  %s2682_s24 = smov [#allocation2]  }
0x14e8   :  { %s2068_s12 = sshll.u32 %s2682_s24, 4  ;;  %s2069_s12 = int_to_ptr.vmem [resolvable:$true] %s2068_s12 }
0x14e9   :  { %2598 = vtanh.f32 %v1953_v19  ;;  %s2600_s27 = scalar_lea.vmem %s2069_s12, 256  ;;  %p2605_p1 = scmp.lt.s32.totalorder %s2069_s12, %s2069_s12 }
0x14ea   :  { %p2601_p0 = scmp.ne.s32.totalorder %s2069_s12, %s2600_s27  ;;  %p2606_p2 = scmp.lt.s32.totalorder %s2600_s27, %s2600_s27 }
0x14ec   :  { %p2607_p3 = por %p2606_p2, %p2605_p1 }
0x14ee   :  { %p2608_p4 = pnand %p2607_p3, %p2601_p0 }
0x14f3   :  { %v2599_v20 = vpop.eup %2598 }
0x14f4   :  { %1957 = vrot.lane.b32.xlu1 %v2599_v20, %s2681_s14 }
0x14f8   :  { %1296 = vrot.lane.b32.xlu1 %v3054_v63, %s2681_s14  ;;  %v2499_v63 = vpack.c.bf16 %v1976_v33, %v1975_v13 }
0x14fa   :  { %2500 = vmatpush3.bf16.msra.mxu1 %v2499_v63 }
0x14fb   :  { %2501 = vmatprep.subr.bf16.mxu1 %v2677_v22 }
0x14fc   :  { %1522 = vrot.lane.b32.xlu1 %v3092_v56, %s2681_s14  ;;  %v1955_v56 = vsub.f32 1.0, %v2597_v8 }
0x14fe   :  { %2503 = vmatpush3.bf16.msra.mxu1 %v2502_v14 }
0x1500   :  { %1857 = vrot.lane.b32.xlu1 %v1855_v18, %s2681_s14 }
0x1566   :  { %v1958_v21 = vpop.permute.xlu1 %1957 }
0x1567   :  { %v1960_v35 = vmul.f32 %v1958_v21, %v1955_v56 }
0x1569   :  { %v1964_v28 = vadd.f32 %v1963_v23, %v1960_v35 }
0x156a   :  { %v1297_v36 = vpop.permute.xlu1 %1296 }
0x156b   :  { %1301 = vst.msk [vmem:[#allocation2] sm:$0xc] %vm1300_vm14, %v1297_v36  ;;  %v1986_v29 = vrot.slane %v1964_v28, 6 }
0x156c   :  { %1304 = vst.msk [vmem:[#allocation2 + $0xa] sm:$0xc] %vm1303_vm15, %v1297_v36 }
0x156d   :  { %1987 = vrot.lane.b32.xlu0 %v1986_v29, %s2681_s14 }
0x156e   :  { %v1523_v22 = vpop.permute.xlu1 %1522 }
0x156f   :  { %1527 = vst.msk [vmem:[#allocation2] sm:$0xc0] %vm1526_vm0, %v1523_v22 }
0x1570   :  { %1530 = vst.msk [vmem:[#allocation2 + $0x2] sm:$0xc0] %vm1529_vm1, %v1523_v22 }
0x1571   :  { %1639 = vst.msk [vmem:[#allocation2 + $0x8] sm:$0x3] %vm1184_vm12, %v3111_v25  ;;  %1409 = vrot.lane.b32.xlu0 %v3073_v37, %s2681_s14 }
0x1572   :  { %1640 = vst.msk [vmem:[#allocation2 + $0x6] sm:$0x3] %vm1187_vm13, %v3111_v25  ;;  %v1858_v32 = vpop.permute.xlu1 %1857 }
0x1573   :  { %1860 = vst.msk [vmem:[#allocation2 + $0x8] sm:$0x30] %vm1413_vm2, %v1858_v32 }
0x1574   :  { %1861 = vst.msk [vmem:[#allocation2 - $0x2] sm:$0x30] %vm1416_vm3, %v1858_v32 }
0x1575   :  { %1748 = vrot.lane.b32.xlu0 %v3127_v40, %s2681_s14 }
0x1579   :  { %1966 = vrot.lane.b32.xlu0 %v1964_v28, %s2681_s14 }
0x15df   :  { %v1988_v38 = vpop.permute.xlu0 %1987 }
0x15e0   :  { %2312 = vmatmul.mubr.msk.f32.vlgmr.msra.gmra.mrb[16].mxu1 %vm1069_vm9, %v1988_v38 }
0x15e3   :  { %v1410_v39 = vpop.permute.xlu0 %1409 }
0x15e4   :  { %1414 = vst.msk [vmem:[#allocation2] sm:$0x30] %vm1413_vm2, %v1410_v39 }
0x15e5   :  { %1417 = vst.msk [vmem:[#allocation2 + $0x6] sm:$0x30] %vm1416_vm3, %v1410_v39 }
0x15e7   :  { %v1749_v25 = vpop.permute.xlu0 %1748 }
0x15e8   :  { %1751 = vst.msk [vmem:[#allocation2 + $0x8] sm:$0xc] %vm1300_vm14, %v1749_v25 }
0x15e9   :  { %1752 = vst.msk [vmem:[#allocation2 + $0x2] sm:$0xc] %vm1303_vm15, %v1749_v25 }
0x15eb   :  { %v1967_v37 = vpop.permute.xlu0 %1966 }
0x15ec   :  { %1969 = vst.msk [vmem:[#allocation2 + $0x8] sm:$0xc0] %vm1526_vm0, %v1967_v37 }
0x15ed   :  { %1970 = vst.msk [vmem:[#allocation2 - $0x6] sm:$0xc0] %vm1529_vm1, %v1967_v37 }
0x15ee   :  { %2611 = shalt.err (!%p2608_p4)
}
0x15ef   :  { %s2612_s7 = scalar_lea.hbm %s2834_s20, 256 }
0x15f0   :  { %p2613_p5 = scmp.ne.s32.totalorder %s2834_s20, %s2612_s7  ;;  %p2616_p6 = scmp.lt.u32.totalorder %s2612_s7, %s2834_s20 }
0x15f2   :  { %p2618_p7 = pnand %p2616_p6, %p2613_p5 }
0x15f4   :  { %2621 = shalt.err (!%p2618_p7)
}
0x15f5   :  { %s2683_s10 = smov 32   ;;  %s2684_s11 = smov 2   ;;  %v2167_v17 = vld [vmem:[%s2829_s19] ss:$0 sm:$0xff] }
0x15f6   :  { %2074 = dma.vmem_to_hbm [thread:$0]  %s2069_s12, 256, %s2834_s20, [#allocation3], %s2683_s10, %s2683_s10, %s2684_s11  }
0x15f7   :  { %s2685_s15 = smov [#allocation4]  }
0x15f8   :  { %s2081_s16 = sshll.u32 %s2685_s15, 4  ;;  %s2082_s16 = int_to_ptr.vmem [resolvable:$true] %s2081_s16 }
0x15f9   :  { %s2622_s18 = scalar_lea.vmem %s2082_s16, 32  ;;  %p2627_p9 = scmp.lt.s32.totalorder %s2082_s16, %s2082_s16 }
0x15fa   :  { %p2623_p8 = scmp.ne.s32.totalorder %s2082_s16, %s2622_s18  ;;  %p2628_p10 = scmp.lt.s32.totalorder %s2622_s18, %s2622_s18 }
0x15fc   :  { %p2629_p11 = por %p2628_p10, %p2627_p9 }
0x15fe   :  { %p2630_p12 = pnand %p2629_p11, %p2623_p8 }
0x16b3   :  { %v2057_v40 = vpop.f32.mrb[16].mxu1 }
0x16b4   :  { %v2058_v42 = vadd.f32 %v2167_v17, %v2057_v40  ;;  %v2313_v43 = vpop.f32.mrb[17].mxu1 }
0x16b6   :  { %v2061_v44 = vmax.f32 %v2058_v42, 0.0 }
0x16b8   :  { %2062 = vst.msk [vmem:[#allocation4] sm:$0x3] %vm1184_vm12, %v2061_v44 }
0x16b9   :  { %2633 = shalt.err (!%p2630_p12)
}
0x16ba   :  { %s2634_s19 = scalar_lea.hbm %s2839_s4, 32 }
0x16bb   :  { %p2635_p13 = scmp.ne.s32.totalorder %s2839_s4, %s2634_s19  ;;  %p2638_p0 = scmp.lt.u32.totalorder %s2634_s19, %s2839_s4 }
0x16bd   :  { %p2640_p1 = pnand %p2638_p0, %p2635_p13 }
0x16bf   :  { %2643 = shalt.err (!%p2640_p1)
}
0x16c0   :  { %2084 = dma.vmem_to_hbm [thread:$0]  %s2082_s16, 32, %s2839_s4, [#allocation5]  }
0x16c1   :  { %2644 = dma.done.wait [#allocation3], 256  }
0x16c2   :  { %2645 = vsyncadd [#allocation3], 4294967040 }
0x16c3   :  { %2646 = dma.done.wait [#allocation5], 32  }
0x16c4   :  { %2647 = vsyncadd [#allocation5], 4294967264 }
0x16c5   :  { %2091 = vsyncpa [#allocation3], 1 }
0x16c6   :  { %2092 = vsyncpa [#allocation5], 1 }

</bundles_post_ra>
